<compile_context>
chip_gen: v6e
topology: v6e:2x2x1
jax: 0.10.0
libtpu: 0.0.40
codegen_flags: <defaults>
</compile_context>

<pallas_src>
import functools

import jax
import jax.numpy as jnp
from jax.experimental import pallas as pl
from jax.experimental.pallas import tpu as pltpu


def _round_up(x, m):
    return (x + m - 1) // m * m


def _denoise_kernel(state_ref, act0_ref,
                    w1s_ref, w1a_ref, tb_ref,
                    w2_ref, b2_ref, w3_ref, b3_ref,
                    out_ref, *, diffusion_steps, max_action):
    # Load weights once; everything is small enough to stay resident in vregs/VMEM.
    w1a = w1a_ref[...]
    w2 = w2_ref[...]
    w3 = w3_ref[...]
    tb = tb_ref[...]                      # (T, Hp) rows: (t/T)*w1t + b1

    bm = state_ref.shape[0]
    hp = w2.shape[1]
    ap = w3.shape[1]

    # ---- Loop-invariant hoists -------------------------------------------------
    # state projection is the same for every diffusion step
    base = jnp.dot(state_ref[...], w1s_ref[...], preferred_element_type=jnp.float32)
    # pre-broadcast biases once (JAX does not CSE broadcast_in_dim across iterations)
    b2b = jnp.broadcast_to(b2_ref[...], (bm, hp))
    b3b = jnp.broadcast_to(b3_ref[...], (bm, ap))

    action = act0_ref[...]
    step_div = float(diffusion_steps)

    # ---- Fully unrolled reverse diffusion loop (T is a compile-time constant) ---
    for t in reversed(range(diffusion_steps)):
        # Layer 1: [state | action | t] @ W1 + b1 == base + a@W1a + ((t/T)*W1t + b1)
        h = base \
            + jnp.dot(action, w1a, preferred_element_type=jnp.float32) \
            + tb[t:t + 1, :]
        h = jnp.maximum(h, 0.0)
        # Layer 2
        h = jnp.maximum(jnp.dot(h, w2, preferred_element_type=jnp.float32) + b2b, 0.0)
        # Layer 3 -> predicted noise
        noise_pred = jnp.dot(h, w3, preferred_element_type=jnp.float32) + b3b
        action = action - noise_pred / step_div

    out_ref[...] = jnp.clip(action, -max_action, max_action)


def diffusion_actor_forward(state, init_action, params, *, diffusion_steps, max_action):
    """Runs the full reverse-diffusion loop inside one Pallas kernel."""
    B, S = state.shape
    A = init_action.shape[1]
    H = params["w2"].shape[0]

    LANE = 128
    # Batch tiling: whole (padded) batch per step for small B, 256-row tiles otherwise.
    if B > 256:
        BM = 256
        B_p = _round_up(B, BM)
    else:
        BM = _round_up(B, 8)
        B_p = BM
    S_p = _round_up(S, LANE)
    A_p = _round_up(A, LANE)
    H_p = _round_up(H, LANE)

    def pad2(x, r, c):
        x = x.astype(jnp.float32)
        return jnp.pad(x, ((0, r - x.shape[0]), (0, c - x.shape[1])))

    state_p = pad2(state, B_p, S_p)
    act0_p = pad2(init_action, B_p, A_p)
    w1s_p = pad2(params["w1s"], S_p, H_p)
    w1a_p = pad2(params["w1a"], A_p, H_p)
    w2_p = pad2(params["w2"], H_p, H_p)
    b2_p = pad2(params["b2"], 1, H_p)
    w3_p = pad2(params["w3"], H_p, A_p)
    b3_p = pad2(params["b3"], 1, A_p)

    # Precompute time-conditioning + layer-1 bias rows: time_bias[t] = (t/T)*w1t + b1.
    # (Python float division matches the reference's t / diffusion_steps exactly.)
    t_norms = jnp.asarray([t / diffusion_steps for t in range(diffusion_steps)],
                          dtype=jnp.float32)[:, None]
    time_bias = t_norms * pad2(params["w1t"], 1, H_p) + pad2(params["b1"], 1, H_p)

    args = (state_p, act0_p, w1s_p, w1a_p, time_bias, w2_p, b2_p, w3_p, b3_p)

    def resident_spec(x):
        # Full array, same block for every grid step -> stays resident in VMEM.
        return pl.BlockSpec(x.shape, lambda i: (0,) * x.ndim)

    in_specs = [
        pl.BlockSpec((BM, S_p), lambda i: (i, 0)),   # state tile
        pl.BlockSpec((BM, A_p), lambda i: (i, 0)),   # initial action tile
        resident_spec(w1s_p),
        resident_spec(w1a_p),
        resident_spec(time_bias),
        resident_spec(w2_p),
        resident_spec(b2_p),
        resident_spec(w3_p),
        resident_spec(b3_p),
    ]

    kernel = functools.partial(_denoise_kernel,
                               diffusion_steps=diffusion_steps,
                               max_action=float(max_action))

    out_p = pl.pallas_call(
        kernel,
        out_shape=jax.ShapeDtypeStruct((B_p, A_p), jnp.float32),
        grid_spec=pltpu.PrefetchScalarGridSpec(
            num_scalar_prefetch=0,
            grid=(B_p // BM,),
            in_specs=in_specs,
            out_specs=pl.BlockSpec((BM, A_p), lambda i: (i, 0)),
        ),
        # init_action is overwritten anyway -> reuse its HBM buffer for the output.
        input_output_aliases={1: 0},
        compiler_params=pltpu.CompilerParams(
            dimension_semantics=("parallel",)),
    )(*args)

    return out_p[:B, :A]


def diffusion_actor_reference(state, init_action, params, *, diffusion_steps, max_action):
    """Pure-JAX reference with identical semantics."""
    hi = jax.lax.Precision.HIGHEST
    action = init_action
    for t in reversed(range(diffusion_steps)):
        t_norm = jnp.float32(t / diffusion_steps)
        h = (jnp.dot(state, params["w1s"], precision=hi)
             + jnp.dot(action, params["w1a"], precision=hi)
             + t_norm * params["w1t"] + params["b1"])
        h = jnp.maximum(h, 0.0)
        h = jnp.maximum(jnp.dot(h, params["w2"], precision=hi) + params["b2"], 0.0)
        noise_pred = jnp.dot(h, params["w3"], precision=hi) + params["b3"]
        action = action - noise_pred / diffusion_steps
    return jnp.clip(action, -max_action, max_action)


def init_params(key, state_dim, action_dim, hidden_dim):
    ks = jax.random.split(key, 6)
    scale_in = 1.0 / jnp.sqrt(state_dim + action_dim + 1.0)
    scale_h = 1.0 / jnp.sqrt(float(hidden_dim))
    return {
        "w1s": jax.random.normal(ks[0], (state_dim, hidden_dim), jnp.float32) * scale_in,
        "w1a": jax.random.normal(ks[1], (action_dim, hidden_dim), jnp.float32) * scale_in,
        "w1t": jax.random.normal(ks[2], (1, hidden_dim), jnp.float32) * scale_in,
        "b1": jnp.zeros((1, hidden_dim), jnp.float32),
        "w2": jax.random.normal(ks[3], (hidden_dim, hidden_dim), jnp.float32) * scale_h,
        "b2": jnp.zeros((1, hidden_dim), jnp.float32),
        "w3": jax.random.normal(ks[4], (hidden_dim, action_dim), jnp.float32) * scale_h,
        "b3": jnp.zeros((1, action_dim), jnp.float32),
    }


if __name__ == "__main__":
    # Small shapes consistent with the module's forward.
    B, STATE_DIM, ACTION_DIM, HIDDEN = 8, 16, 8, 32
    DIFFUSION_STEPS = 10
    MAX_ACTION = 1.0

    root = jax.random.PRNGKey(0)
    k_state, k_noise, k_params = jax.random.split(root, 3)

    state = jax.random.normal(k_state, (B, STATE_DIM), jnp.float32)
    # torch.randn initial action, made deterministic here.
    init_action = jax.random.normal(k_noise, (B, ACTION_DIM), jnp.float32)
    params = init_params(k_params, STATE_DIM, ACTION_DIM, HIDDEN)

    out = diffusion_actor_forward(state, init_action, params,
                                  diffusion_steps=DIFFUSION_STEPS,
                                  max_action=MAX_ACTION)
    out = jax.block_until_ready(out)

    ref = diffusion_actor_reference(state, init_action, params,
                                    diffusion_steps=DIFFUSION_STEPS,
                                    max_action=MAX_ACTION)
    assert out.shape == (B, ACTION_DIM)
    assert jnp.allclose(out, ref, atol=1e-4, rtol=1e-4), "mismatch vs reference"

    print("KERNEL_OK")
</pallas_src>

<mosaic_0001>
module attributes {stable_mosaic.version = 11 : i64} {
  func.func @_denoise_kernel(%arg0: i32, %arg1: memref<8x128xf32, #tpu.memory_space<vmem>>, %arg2: memref<8x128xf32, #tpu.memory_space<vmem>>, %arg3: memref<128x128xf32, #tpu.memory_space<vmem>>, %arg4: memref<128x128xf32, #tpu.memory_space<vmem>>, %arg5: memref<10x128xf32, #tpu.memory_space<vmem>>, %arg6: memref<128x128xf32, #tpu.memory_space<vmem>>, %arg7: memref<1x128xf32, #tpu.memory_space<vmem>>, %arg8: memref<128x128xf32, #tpu.memory_space<vmem>>, %arg9: memref<1x128xf32, #tpu.memory_space<vmem>>, %arg10: memref<8x128xf32, #tpu.memory_space<vmem>>) attributes {dimension_semantics = [#tpu.dimension_semantics<parallel>], iteration_bounds = array<i64: 1>, scalar_prefetch = 0 : i64, scratch_operands = 0 : i64, tpu.core_type = #tpu.core_type<tc>, window_params = [{transform_indices = @transform_0, window_bounds = array<i64: 8, 128>}, {transform_indices = @transform_1, window_bounds = array<i64: 8, 128>}, {pipeline_mode = #tpu.pipeline_mode<synchronous>, transform_indices = @transform_2, window_bounds = array<i64: 128, 128>}, {pipeline_mode = #tpu.pipeline_mode<synchronous>, transform_indices = @transform_3, window_bounds = array<i64: 128, 128>}, {pipeline_mode = #tpu.pipeline_mode<synchronous>, transform_indices = @transform_4, window_bounds = array<i64: 10, 128>}, {pipeline_mode = #tpu.pipeline_mode<synchronous>, transform_indices = @transform_5, window_bounds = array<i64: 128, 128>}, {pipeline_mode = #tpu.pipeline_mode<synchronous>, transform_indices = @transform_6, window_bounds = array<i64: 1, 128>}, {pipeline_mode = #tpu.pipeline_mode<synchronous>, transform_indices = @transform_7, window_bounds = array<i64: 128, 128>}, {pipeline_mode = #tpu.pipeline_mode<synchronous>, transform_indices = @transform_8, window_bounds = array<i64: 1, 128>}, {transform_indices = @transform_9, window_bounds = array<i64: 8, 128>}]} {
    %c0 = arith.constant 0 : index
    %c0_0 = arith.constant 0 : index
    %0 = vector.load %arg4[%c0, %c0_0] : memref<128x128xf32, #tpu.memory_space<vmem>>, vector<128x128xf32>
    %c0_1 = arith.constant 0 : index
    %c0_2 = arith.constant 0 : index
    %1 = vector.load %arg6[%c0_1, %c0_2] : memref<128x128xf32, #tpu.memory_space<vmem>>, vector<128x128xf32>
    %c0_3 = arith.constant 0 : index
    %c0_4 = arith.constant 0 : index
    %2 = vector.load %arg8[%c0_3, %c0_4] : memref<128x128xf32, #tpu.memory_space<vmem>>, vector<128x128xf32>
    %c0_5 = arith.constant 0 : index
    %c0_6 = arith.constant 0 : index
    %3 = vector.load %arg5[%c0_5, %c0_6] : memref<10x128xf32, #tpu.memory_space<vmem>>, vector<10x128xf32>
    %c0_7 = arith.constant 0 : index
    %c0_8 = arith.constant 0 : index
    %4 = vector.load %arg1[%c0_7, %c0_8] : memref<8x128xf32, #tpu.memory_space<vmem>>, vector<8x128xf32>
    %c0_9 = arith.constant 0 : index
    %c0_10 = arith.constant 0 : index
    %5 = vector.load %arg3[%c0_9, %c0_10] : memref<128x128xf32, #tpu.memory_space<vmem>>, vector<128x128xf32>
    %cst = arith.constant dense<0.000000e+00> : vector<8x128xf32>
    %6 = tpu.matmul %4, %5, %cst {dimension_numbers = #tpu.dot_dimension_numbers<[1], [0], [0], [1], [0, 0, 1, 1], [], []>} : vector<8x128xf32>, vector<128x128xf32>, vector<8x128xf32> -> vector<8x128xf32>
    %c0_11 = arith.constant 0 : index
    %c0_12 = arith.constant 0 : index
    %7 = vector.load %arg7[%c0_11, %c0_12] : memref<1x128xf32, #tpu.memory_space<vmem>>, vector<1x128xf32>
    %8 = vector.shape_cast %7 : vector<1x128xf32> to vector<1x128xf32>
    %9 = vector.broadcast %8 : vector<1x128xf32> to vector<8x128xf32>
    %c0_13 = arith.constant 0 : index
    %c0_14 = arith.constant 0 : index
    %10 = vector.load %arg9[%c0_13, %c0_14] : memref<1x128xf32, #tpu.memory_space<vmem>>, vector<1x128xf32>
    %11 = vector.shape_cast %10 : vector<1x128xf32> to vector<1x128xf32>
    %12 = vector.broadcast %11 : vector<1x128xf32> to vector<8x128xf32>
    %c0_15 = arith.constant 0 : index
    %c0_16 = arith.constant 0 : index
    %13 = vector.load %arg2[%c0_15, %c0_16] : memref<8x128xf32, #tpu.memory_space<vmem>>, vector<8x128xf32>
    %cst_17 = arith.constant dense<0.000000e+00> : vector<8x128xf32>
    %14 = tpu.matmul %13, %0, %cst_17 {dimension_numbers = #tpu.dot_dimension_numbers<[1], [0], [0], [1], [0, 0, 1, 1], [], []>} : vector<8x128xf32>, vector<128x128xf32>, vector<8x128xf32> -> vector<8x128xf32>
    %15 = arith.addf %6, %14 : vector<8x128xf32>
    %16 = vector.extract_strided_slice %3 {offsets = [9, 0], sizes = [1, 128], strides = [1, 1]} : vector<10x128xf32> to vector<1x128xf32>
    %17 = vector.broadcast %16 : vector<1x128xf32> to vector<8x128xf32>
    %18 = arith.addf %15, %17 : vector<8x128xf32>
    %cst_18 = arith.constant 0.000000e+00 : f32
    %19 = vector.broadcast %cst_18 : f32 to vector<8x128xf32>
    %20 = arith.maximumf %18, %19 : vector<8x128xf32>
    %cst_19 = arith.constant dense<0.000000e+00> : vector<8x128xf32>
    %21 = tpu.matmul %20, %1, %cst_19 {dimension_numbers = #tpu.dot_dimension_numbers<[1], [0], [0], [1], [0, 0, 1, 1], [], []>} : vector<8x128xf32>, vector<128x128xf32>, vector<8x128xf32> -> vector<8x128xf32>
    %22 = arith.addf %21, %9 : vector<8x128xf32>
    %cst_20 = arith.constant 0.000000e+00 : f32
    %23 = vector.broadcast %cst_20 : f32 to vector<8x128xf32>
    %24 = arith.maximumf %22, %23 : vector<8x128xf32>
    %cst_21 = arith.constant dense<0.000000e+00> : vector<8x128xf32>
    %25 = tpu.matmul %24, %2, %cst_21 {dimension_numbers = #tpu.dot_dimension_numbers<[1], [0], [0], [1], [0, 0, 1, 1], [], []>} : vector<8x128xf32>, vector<128x128xf32>, vector<8x128xf32> -> vector<8x128xf32>
    %26 = arith.addf %25, %12 : vector<8x128xf32>
    %cst_22 = arith.constant 1.000000e+01 : f32
    %27 = vector.broadcast %cst_22 : f32 to vector<8x128xf32>
    %28 = arith.divf %26, %27 : vector<8x128xf32>
    %29 = arith.subf %13, %28 : vector<8x128xf32>
    %cst_23 = arith.constant dense<0.000000e+00> : vector<8x128xf32>
    %30 = tpu.matmul %29, %0, %cst_23 {dimension_numbers = #tpu.dot_dimension_numbers<[1], [0], [0], [1], [0, 0, 1, 1], [], []>} : vector<8x128xf32>, vector<128x128xf32>, vector<8x128xf32> -> vector<8x128xf32>
    %31 = arith.addf %6, %30 : vector<8x128xf32>
    %32 = vector.extract_strided_slice %3 {offsets = [8, 0], sizes = [1, 128], strides = [1, 1]} : vector<10x128xf32> to vector<1x128xf32>
    %33 = vector.broadcast %32 : vector<1x128xf32> to vector<8x128xf32>
    %34 = arith.addf %31, %33 : vector<8x128xf32>
    %cst_24 = arith.constant 0.000000e+00 : f32
    %35 = vector.broadcast %cst_24 : f32 to vector<8x128xf32>
    %36 = arith.maximumf %34, %35 : vector<8x128xf32>
    %cst_25 = arith.constant dense<0.000000e+00> : vector<8x128xf32>
    %37 = tpu.matmul %36, %1, %cst_25 {dimension_numbers = #tpu.dot_dimension_numbers<[1], [0], [0], [1], [0, 0, 1, 1], [], []>} : vector<8x128xf32>, vector<128x128xf32>, vector<8x128xf32> -> vector<8x128xf32>
    %38 = arith.addf %37, %9 : vector<8x128xf32>
    %cst_26 = arith.constant 0.000000e+00 : f32
    %39 = vector.broadcast %cst_26 : f32 to vector<8x128xf32>
    %40 = arith.maximumf %38, %39 : vector<8x128xf32>
    %cst_27 = arith.constant dense<0.000000e+00> : vector<8x128xf32>
    %41 = tpu.matmul %40, %2, %cst_27 {dimension_numbers = #tpu.dot_dimension_numbers<[1], [0], [0], [1], [0, 0, 1, 1], [], []>} : vector<8x128xf32>, vector<128x128xf32>, vector<8x128xf32> -> vector<8x128xf32>
    %42 = arith.addf %41, %12 : vector<8x128xf32>
    %cst_28 = arith.constant 1.000000e+01 : f32
    %43 = vector.broadcast %cst_28 : f32 to vector<8x128xf32>
    %44 = arith.divf %42, %43 : vector<8x128xf32>
    %45 = arith.subf %29, %44 : vector<8x128xf32>
    %cst_29 = arith.constant dense<0.000000e+00> : vector<8x128xf32>
    %46 = tpu.matmul %45, %0, %cst_29 {dimension_numbers = #tpu.dot_dimension_numbers<[1], [0], [0], [1], [0, 0, 1, 1], [], []>} : vector<8x128xf32>, vector<128x128xf32>, vector<8x128xf32> -> vector<8x128xf32>
    %47 = arith.addf %6, %46 : vector<8x128xf32>
    %48 = vector.extract_strided_slice %3 {offsets = [7, 0], sizes = [1, 128], strides = [1, 1]} : vector<10x128xf32> to vector<1x128xf32>
    %49 = vector.broadcast %48 : vector<1x128xf32> to vector<8x128xf32>
    %50 = arith.addf %47, %49 : vector<8x128xf32>
    %cst_30 = arith.constant 0.000000e+00 : f32
    %51 = vector.broadcast %cst_30 : f32 to vector<8x128xf32>
    %52 = arith.maximumf %50, %51 : vector<8x128xf32>
    %cst_31 = arith.constant dense<0.000000e+00> : vector<8x128xf32>
    %53 = tpu.matmul %52, %1, %cst_31 {dimension_numbers = #tpu.dot_dimension_numbers<[1], [0], [0], [1], [0, 0, 1, 1], [], []>} : vector<8x128xf32>, vector<128x128xf32>, vector<8x128xf32> -> vector<8x128xf32>
    %54 = arith.addf %53, %9 : vector<8x128xf32>
    %cst_32 = arith.constant 0.000000e+00 : f32
    %55 = vector.broadcast %cst_32 : f32 to vector<8x128xf32>
    %56 = arith.maximumf %54, %55 : vector<8x128xf32>
    %cst_33 = arith.constant dense<0.000000e+00> : vector<8x128xf32>
    %57 = tpu.matmul %56, %2, %cst_33 {dimension_numbers = #tpu.dot_dimension_numbers<[1], [0], [0], [1], [0, 0, 1, 1], [], []>} : vector<8x128xf32>, vector<128x128xf32>, vector<8x128xf32> -> vector<8x128xf32>
    %58 = arith.addf %57, %12 : vector<8x128xf32>
    %cst_34 = arith.constant 1.000000e+01 : f32
    %59 = vector.broadcast %cst_34 : f32 to vector<8x128xf32>
    %60 = arith.divf %58, %59 : vector<8x128xf32>
    %61 = arith.subf %45, %60 : vector<8x128xf32>
    %cst_35 = arith.constant dense<0.000000e+00> : vector<8x128xf32>
    %62 = tpu.matmul %61, %0, %cst_35 {dimension_numbers = #tpu.dot_dimension_numbers<[1], [0], [0], [1], [0, 0, 1, 1], [], []>} : vector<8x128xf32>, vector<128x128xf32>, vector<8x128xf32> -> vector<8x128xf32>
    %63 = arith.addf %6, %62 : vector<8x128xf32>
    %64 = vector.extract_strided_slice %3 {offsets = [6, 0], sizes = [1, 128], strides = [1, 1]} : vector<10x128xf32> to vector<1x128xf32>
    %65 = vector.broadcast %64 : vector<1x128xf32> to vector<8x128xf32>
    %66 = arith.addf %63, %65 : vector<8x128xf32>
    %cst_36 = arith.constant 0.000000e+00 : f32
    %67 = vector.broadcast %cst_36 : f32 to vector<8x128xf32>
    %68 = arith.maximumf %66, %67 : vector<8x128xf32>
    %cst_37 = arith.constant dense<0.000000e+00> : vector<8x128xf32>
    %69 = tpu.matmul %68, %1, %cst_37 {dimension_numbers = #tpu.dot_dimension_numbers<[1], [0], [0], [1], [0, 0, 1, 1], [], []>} : vector<8x128xf32>, vector<128x128xf32>, vector<8x128xf32> -> vector<8x128xf32>
    %70 = arith.addf %69, %9 : vector<8x128xf32>
    %cst_38 = arith.constant 0.000000e+00 : f32
    %71 = vector.broadcast %cst_38 : f32 to vector<8x128xf32>
    %72 = arith.maximumf %70, %71 : vector<8x128xf32>
    %cst_39 = arith.constant dense<0.000000e+00> : vector<8x128xf32>
    %73 = tpu.matmul %72, %2, %cst_39 {dimension_numbers = #tpu.dot_dimension_numbers<[1], [0], [0], [1], [0, 0, 1, 1], [], []>} : vector<8x128xf32>, vector<128x128xf32>, vector<8x128xf32> -> vector<8x128xf32>
    %74 = arith.addf %73, %12 : vector<8x128xf32>
    %cst_40 = arith.constant 1.000000e+01 : f32
    %75 = vector.broadcast %cst_40 : f32 to vector<8x128xf32>
    %76 = arith.divf %74, %75 : vector<8x128xf32>
    %77 = arith.subf %61, %76 : vector<8x128xf32>
    %cst_41 = arith.constant dense<0.000000e+00> : vector<8x128xf32>
    %78 = tpu.matmul %77, %0, %cst_41 {dimension_numbers = #tpu.dot_dimension_numbers<[1], [0], [0], [1], [0, 0, 1, 1], [], []>} : vector<8x128xf32>, vector<128x128xf32>, vector<8x128xf32> -> vector<8x128xf32>
    %79 = arith.addf %6, %78 : vector<8x128xf32>
    %80 = vector.extract_strided_slice %3 {offsets = [5, 0], sizes = [1, 128], strides = [1, 1]} : vector<10x128xf32> to vector<1x128xf32>
    %81 = vector.broadcast %80 : vector<1x128xf32> to vector<8x128xf32>
    %82 = arith.addf %79, %81 : vector<8x128xf32>
    %cst_42 = arith.constant 0.000000e+00 : f32
    %83 = vector.broadcast %cst_42 : f32 to vector<8x128xf32>
    %84 = arith.maximumf %82, %83 : vector<8x128xf32>
    %cst_43 = arith.constant dense<0.000000e+00> : vector<8x128xf32>
    %85 = tpu.matmul %84, %1, %cst_43 {dimension_numbers = #tpu.dot_dimension_numbers<[1], [0], [0], [1], [0, 0, 1, 1], [], []>} : vector<8x128xf32>, vector<128x128xf32>, vector<8x128xf32> -> vector<8x128xf32>
    %86 = arith.addf %85, %9 : vector<8x128xf32>
    %cst_44 = arith.constant 0.000000e+00 : f32
    %87 = vector.broadcast %cst_44 : f32 to vector<8x128xf32>
    %88 = arith.maximumf %86, %87 : vector<8x128xf32>
    %cst_45 = arith.constant dense<0.000000e+00> : vector<8x128xf32>
    %89 = tpu.matmul %88, %2, %cst_45 {dimension_numbers = #tpu.dot_dimension_numbers<[1], [0], [0], [1], [0, 0, 1, 1], [], []>} : vector<8x128xf32>, vector<128x128xf32>, vector<8x128xf32> -> vector<8x128xf32>
    %90 = arith.addf %89, %12 : vector<8x128xf32>
    %cst_46 = arith.constant 1.000000e+01 : f32
    %91 = vector.broadcast %cst_46 : f32 to vector<8x128xf32>
    %92 = arith.divf %90, %91 : vector<8x128xf32>
    %93 = arith.subf %77, %92 : vector<8x128xf32>
    %cst_47 = arith.constant dense<0.000000e+00> : vector<8x128xf32>
    %94 = tpu.matmul %93, %0, %cst_47 {dimension_numbers = #tpu.dot_dimension_numbers<[1], [0], [0], [1], [0, 0, 1, 1], [], []>} : vector<8x128xf32>, vector<128x128xf32>, vector<8x128xf32> -> vector<8x128xf32>
    %95 = arith.addf %6, %94 : vector<8x128xf32>
    %96 = vector.extract_strided_slice %3 {offsets = [4, 0], sizes = [1, 128], strides = [1, 1]} : vector<10x128xf32> to vector<1x128xf32>
    %97 = vector.broadcast %96 : vector<1x128xf32> to vector<8x128xf32>
    %98 = arith.addf %95, %97 : vector<8x128xf32>
    %cst_48 = arith.constant 0.000000e+00 : f32
    %99 = vector.broadcast %cst_48 : f32 to vector<8x128xf32>
    %100 = arith.maximumf %98, %99 : vector<8x128xf32>
    %cst_49 = arith.constant dense<0.000000e+00> : vector<8x128xf32>
    %101 = tpu.matmul %100, %1, %cst_49 {dimension_numbers = #tpu.dot_dimension_numbers<[1], [0], [0], [1], [0, 0, 1, 1], [], []>} : vector<8x128xf32>, vector<128x128xf32>, vector<8x128xf32> -> vector<8x128xf32>
    %102 = arith.addf %101, %9 : vector<8x128xf32>
    %cst_50 = arith.constant 0.000000e+00 : f32
    %103 = vector.broadcast %cst_50 : f32 to vector<8x128xf32>
    %104 = arith.maximumf %102, %103 : vector<8x128xf32>
    %cst_51 = arith.constant dense<0.000000e+00> : vector<8x128xf32>
    %105 = tpu.matmul %104, %2, %cst_51 {dimension_numbers = #tpu.dot_dimension_numbers<[1], [0], [0], [1], [0, 0, 1, 1], [], []>} : vector<8x128xf32>, vector<128x128xf32>, vector<8x128xf32> -> vector<8x128xf32>
    %106 = arith.addf %105, %12 : vector<8x128xf32>
    %cst_52 = arith.constant 1.000000e+01 : f32
    %107 = vector.broadcast %cst_52 : f32 to vector<8x128xf32>
    %108 = arith.divf %106, %107 : vector<8x128xf32>
    %109 = arith.subf %93, %108 : vector<8x128xf32>
    %cst_53 = arith.constant dense<0.000000e+00> : vector<8x128xf32>
    %110 = tpu.matmul %109, %0, %cst_53 {dimension_numbers = #tpu.dot_dimension_numbers<[1], [0], [0], [1], [0, 0, 1, 1], [], []>} : vector<8x128xf32>, vector<128x128xf32>, vector<8x128xf32> -> vector<8x128xf32>
    %111 = arith.addf %6, %110 : vector<8x128xf32>
    %112 = vector.extract_strided_slice %3 {offsets = [3, 0], sizes = [1, 128], strides = [1, 1]} : vector<10x128xf32> to vector<1x128xf32>
    %113 = vector.broadcast %112 : vector<1x128xf32> to vector<8x128xf32>
    %114 = arith.addf %111, %113 : vector<8x128xf32>
    %cst_54 = arith.constant 0.000000e+00 : f32
    %115 = vector.broadcast %cst_54 : f32 to vector<8x128xf32>
    %116 = arith.maximumf %114, %115 : vector<8x128xf32>
    %cst_55 = arith.constant dense<0.000000e+00> : vector<8x128xf32>
    %117 = tpu.matmul %116, %1, %cst_55 {dimension_numbers = #tpu.dot_dimension_numbers<[1], [0], [0], [1], [0, 0, 1, 1], [], []>} : vector<8x128xf32>, vector<128x128xf32>, vector<8x128xf32> -> vector<8x128xf32>
    %118 = arith.addf %117, %9 : vector<8x128xf32>
    %cst_56 = arith.constant 0.000000e+00 : f32
    %119 = vector.broadcast %cst_56 : f32 to vector<8x128xf32>
    %120 = arith.maximumf %118, %119 : vector<8x128xf32>
    %cst_57 = arith.constant dense<0.000000e+00> : vector<8x128xf32>
    %121 = tpu.matmul %120, %2, %cst_57 {dimension_numbers = #tpu.dot_dimension_numbers<[1], [0], [0], [1], [0, 0, 1, 1], [], []>} : vector<8x128xf32>, vector<128x128xf32>, vector<8x128xf32> -> vector<8x128xf32>
    %122 = arith.addf %121, %12 : vector<8x128xf32>
    %cst_58 = arith.constant 1.000000e+01 : f32
    %123 = vector.broadcast %cst_58 : f32 to vector<8x128xf32>
    %124 = arith.divf %122, %123 : vector<8x128xf32>
    %125 = arith.subf %109, %124 : vector<8x128xf32>
    %cst_59 = arith.constant dense<0.000000e+00> : vector<8x128xf32>
    %126 = tpu.matmul %125, %0, %cst_59 {dimension_numbers = #tpu.dot_dimension_numbers<[1], [0], [0], [1], [0, 0, 1, 1], [], []>} : vector<8x128xf32>, vector<128x128xf32>, vector<8x128xf32> -> vector<8x128xf32>
    %127 = arith.addf %6, %126 : vector<8x128xf32>
    %128 = vector.extract_strided_slice %3 {offsets = [2, 0], sizes = [1, 128], strides = [1, 1]} : vector<10x128xf32> to vector<1x128xf32>
    %129 = vector.broadcast %128 : vector<1x128xf32> to vector<8x128xf32>
    %130 = arith.addf %127, %129 : vector<8x128xf32>
    %cst_60 = arith.constant 0.000000e+00 : f32
    %131 = vector.broadcast %cst_60 : f32 to vector<8x128xf32>
    %132 = arith.maximumf %130, %131 : vector<8x128xf32>
    %cst_61 = arith.constant dense<0.000000e+00> : vector<8x128xf32>
    %133 = tpu.matmul %132, %1, %cst_61 {dimension_numbers = #tpu.dot_dimension_numbers<[1], [0], [0], [1], [0, 0, 1, 1], [], []>} : vector<8x128xf32>, vector<128x128xf32>, vector<8x128xf32> -> vector<8x128xf32>
    %134 = arith.addf %133, %9 : vector<8x128xf32>
    %cst_62 = arith.constant 0.000000e+00 : f32
    %135 = vector.broadcast %cst_62 : f32 to vector<8x128xf32>
    %136 = arith.maximumf %134, %135 : vector<8x128xf32>
    %cst_63 = arith.constant dense<0.000000e+00> : vector<8x128xf32>
    %137 = tpu.matmul %136, %2, %cst_63 {dimension_numbers = #tpu.dot_dimension_numbers<[1], [0], [0], [1], [0, 0, 1, 1], [], []>} : vector<8x128xf32>, vector<128x128xf32>, vector<8x128xf32> -> vector<8x128xf32>
    %138 = arith.addf %137, %12 : vector<8x128xf32>
    %cst_64 = arith.constant 1.000000e+01 : f32
    %139 = vector.broadcast %cst_64 : f32 to vector<8x128xf32>
    %140 = arith.divf %138, %139 : vector<8x128xf32>
    %141 = arith.subf %125, %140 : vector<8x128xf32>
    %cst_65 = arith.constant dense<0.000000e+00> : vector<8x128xf32>
    %142 = tpu.matmul %141, %0, %cst_65 {dimension_numbers = #tpu.dot_dimension_numbers<[1], [0], [0], [1], [0, 0, 1, 1], [], []>} : vector<8x128xf32>, vector<128x128xf32>, vector<8x128xf32> -> vector<8x128xf32>
    %143 = arith.addf %6, %142 : vector<8x128xf32>
    %144 = vector.extract_strided_slice %3 {offsets = [1, 0], sizes = [1, 128], strides = [1, 1]} : vector<10x128xf32> to vector<1x128xf32>
    %145 = vector.broadcast %144 : vector<1x128xf32> to vector<8x128xf32>
    %146 = arith.addf %143, %145 : vector<8x128xf32>
    %cst_66 = arith.constant 0.000000e+00 : f32
    %147 = vector.broadcast %cst_66 : f32 to vector<8x128xf32>
    %148 = arith.maximumf %146, %147 : vector<8x128xf32>
    %cst_67 = arith.constant dense<0.000000e+00> : vector<8x128xf32>
    %149 = tpu.matmul %148, %1, %cst_67 {dimension_numbers = #tpu.dot_dimension_numbers<[1], [0], [0], [1], [0, 0, 1, 1], [], []>} : vector<8x128xf32>, vector<128x128xf32>, vector<8x128xf32> -> vector<8x128xf32>
    %150 = arith.addf %149, %9 : vector<8x128xf32>
    %cst_68 = arith.constant 0.000000e+00 : f32
    %151 = vector.broadcast %cst_68 : f32 to vector<8x128xf32>
    %152 = arith.maximumf %150, %151 : vector<8x128xf32>
    %cst_69 = arith.constant dense<0.000000e+00> : vector<8x128xf32>
    %153 = tpu.matmul %152, %2, %cst_69 {dimension_numbers = #tpu.dot_dimension_numbers<[1], [0], [0], [1], [0, 0, 1, 1], [], []>} : vector<8x128xf32>, vector<128x128xf32>, vector<8x128xf32> -> vector<8x128xf32>
    %154 = arith.addf %153, %12 : vector<8x128xf32>
    %cst_70 = arith.constant 1.000000e+01 : f32
    %155 = vector.broadcast %cst_70 : f32 to vector<8x128xf32>
    %156 = arith.divf %154, %155 : vector<8x128xf32>
    %157 = arith.subf %141, %156 : vector<8x128xf32>
    %cst_71 = arith.constant dense<0.000000e+00> : vector<8x128xf32>
    %158 = tpu.matmul %157, %0, %cst_71 {dimension_numbers = #tpu.dot_dimension_numbers<[1], [0], [0], [1], [0, 0, 1, 1], [], []>} : vector<8x128xf32>, vector<128x128xf32>, vector<8x128xf32> -> vector<8x128xf32>
    %159 = arith.addf %6, %158 : vector<8x128xf32>
    %160 = vector.extract_strided_slice %3 {offsets = [0, 0], sizes = [1, 128], strides = [1, 1]} : vector<10x128xf32> to vector<1x128xf32>
    %161 = vector.broadcast %160 : vector<1x128xf32> to vector<8x128xf32>
    %162 = arith.addf %159, %161 : vector<8x128xf32>
    %cst_72 = arith.constant 0.000000e+00 : f32
    %163 = vector.broadcast %cst_72 : f32 to vector<8x128xf32>
    %164 = arith.maximumf %162, %163 : vector<8x128xf32>
    %cst_73 = arith.constant dense<0.000000e+00> : vector<8x128xf32>
    %165 = tpu.matmul %164, %1, %cst_73 {dimension_numbers = #tpu.dot_dimension_numbers<[1], [0], [0], [1], [0, 0, 1, 1], [], []>} : vector<8x128xf32>, vector<128x128xf32>, vector<8x128xf32> -> vector<8x128xf32>
    %166 = arith.addf %165, %9 : vector<8x128xf32>
    %cst_74 = arith.constant 0.000000e+00 : f32
    %167 = vector.broadcast %cst_74 : f32 to vector<8x128xf32>
    %168 = arith.maximumf %166, %167 : vector<8x128xf32>
    %cst_75 = arith.constant dense<0.000000e+00> : vector<8x128xf32>
    %169 = tpu.matmul %168, %2, %cst_75 {dimension_numbers = #tpu.dot_dimension_numbers<[1], [0], [0], [1], [0, 0, 1, 1], [], []>} : vector<8x128xf32>, vector<128x128xf32>, vector<8x128xf32> -> vector<8x128xf32>
    %170 = arith.addf %169, %12 : vector<8x128xf32>
    %cst_76 = arith.constant 1.000000e+01 : f32
    %171 = vector.broadcast %cst_76 : f32 to vector<8x128xf32>
    %172 = arith.divf %170, %171 : vector<8x128xf32>
    %173 = arith.subf %157, %172 : vector<8x128xf32>
    %cst_77 = arith.constant -1.000000e+00 : f32
    %cst_78 = arith.constant 1.000000e+00 : f32
    %174 = vector.broadcast %cst_77 : f32 to vector<8x128xf32>
    %175 = arith.maximumf %174, %173 : vector<8x128xf32>
    %176 = vector.broadcast %cst_78 : f32 to vector<8x128xf32>
    %177 = arith.minimumf %176, %175 : vector<8x128xf32>
    %c0_79 = arith.constant 0 : index
    %c0_80 = arith.constant 0 : index
    %178 = vector.load %arg10[%c0_79, %c0_80] : memref<8x128xf32, #tpu.memory_space<vmem>>, vector<8x128xf32>
    tpu.vector_store %arg10[%c0_79, %c0_80], %177 {strides = array<i32>} : memref<8x128xf32, #tpu.memory_space<vmem>>, vector<8x128xf32>,
    return
  }
  func.func @transform_0(%arg0: i32) -> (i32, i32) {
    %c0_i32 = arith.constant 0 : i32
    %c0_i32_0 = arith.constant 0 : i32
    return %arg0, %c0_i32 : i32, i32
  }
  func.func @transform_1(%arg0: i32) -> (i32, i32) {
    %c0_i32 = arith.constant 0 : i32
    %c0_i32_0 = arith.constant 0 : i32
    return %arg0, %c0_i32 : i32, i32
  }
  func.func @transform_2(%arg0: i32) -> (i32, i32) {
    %c0_i32 = arith.constant 0 : i32
    %c0_i32_0 = arith.constant 0 : i32
    %c0_i32_1 = arith.constant 0 : i32
    return %c0_i32, %c0_i32_0 : i32, i32
  }
  func.func @transform_3(%arg0: i32) -> (i32, i32) {
    %c0_i32 = arith.constant 0 : i32
    %c0_i32_0 = arith.constant 0 : i32
    %c0_i32_1 = arith.constant 0 : i32
    return %c0_i32, %c0_i32_0 : i32, i32
  }
  func.func @transform_4(%arg0: i32) -> (i32, i32) {
    %c0_i32 = arith.constant 0 : i32
    %c0_i32_0 = arith.constant 0 : i32
    %c0_i32_1 = arith.constant 0 : i32
    return %c0_i32, %c0_i32_0 : i32, i32
  }
  func.func @transform_5(%arg0: i32) -> (i32, i32) {
    %c0_i32 = arith.constant 0 : i32
    %c0_i32_0 = arith.constant 0 : i32
    %c0_i32_1 = arith.constant 0 : i32
    return %c0_i32, %c0_i32_0 : i32, i32
  }
  func.func @transform_6(%arg0: i32) -> (i32, i32) {
    %c0_i32 = arith.constant 0 : i32
    %c0_i32_0 = arith.constant 0 : i32
    %c0_i32_1 = arith.constant 0 : i32
    return %c0_i32, %c0_i32_0 : i32, i32
  }
  func.func @transform_7(%arg0: i32) -> (i32, i32) {
    %c0_i32 = arith.constant 0 : i32
    %c0_i32_0 = arith.constant 0 : i32
    %c0_i32_1 = arith.constant 0 : i32
    return %c0_i32, %c0_i32_0 : i32, i32
  }
  func.func @transform_8(%arg0: i32) -> (i32, i32) {
    %c0_i32 = arith.constant 0 : i32
    %c0_i32_0 = arith.constant 0 : i32
    %c0_i32_1 = arith.constant 0 : i32
    return %c0_i32, %c0_i32_0 : i32, i32
  }
  func.func @transform_9(%arg0: i32) -> (i32, i32) {
    %c0_i32 = arith.constant 0 : i32
    %c0_i32_0 = arith.constant 0 : i32
    return %arg0, %c0_i32 : i32, i32
  }
}

</mosaic_0001>

<bundles_post_ra>
// kernel: tpu_custom_call.1
= control target key start
LH: loop header
LB: loop body
LE: loop exit
PB: predicated region body
PF: predicated region fallthrough
CT: control target
= control target key end

     0   :  { %14 = vsyncpa [#allocation3], 0  ;;  %s5767_s0 = inlined_call_operand.hbm [shape: f32[8,128], index: 0, kind: input, shape index: {}]   ;;  %s5768_s1 = inlined_call_operand.hbm [shape: f32[8,128], index: 1, kind: input, shape index: {}, may-alias: {1,9}]   ;;  %s5769_s2 = inlined_call_operand.hbm [shape: f32[128,128], index: 2, kind: input, shape index: {}]   ;;  %s5770_s3 = inlined_call_operand.hbm [shape: f32[128,128], index: 3, kind: input, shape index: {}]   ;;  %s5771_s4 = inlined_call_operand.vmem [shape: f32[10,128], index: 4, kind: input, shape index: {}]   ;;  %s5772_s5 = inlined_call_operand.hbm [shape: f32[128,128], index: 5, kind: input, shape index: {}]   ;;  %s5773_s6 = inlined_call_operand.vmem [shape: f32[1,128], index: 6, kind: input, shape index: {}]   ;;  %s5774_s7 = inlined_call_operand.hbm [shape: f32[128,128], index: 7, kind: input, shape index: {}]   ;;  %s5775_s8 = inlined_call_operand.vmem [shape: f32[1,128], index: 8, kind: input, shape index: {}]   ;;  %s5776_s9 = inlined_call_operand.hbm [shape: f32[8,128], index: 9, kind: output, shape index: {}, may-alias: {1,9}]  }
   0x1   :  { %15 = vsyncpa [#allocation6], 0 }
   0x2   :  { %16 = vsyncpa [#allocation9], 0 }
   0x3   :  { %17 = vsyncpa [#allocation12], 0 }
   0x4   :  { %18 = vsyncpa [#allocation4], 0  ;;  %s4328_s30 = smov [#allocation5]  }
   0x5   :  { %s35_s10 = sshll.u32 %s4328_s30, 4  ;;  %s36_s10 = int_to_ptr.vmem [resolvable:$true] %s35_s10 }
   0x6   :  { %s4186_s11 = scalar_lea.vmem %s36_s10, 128  ;;  %p4191_p1 = scmp.lt.s32.totalorder %s36_s10, %s36_s10 }
   0x7   :  { %p4187_p0 = scmp.ne.s32.totalorder %s36_s10, %s4186_s11  ;;  %p4192_p2 = scmp.lt.s32.totalorder %s4186_s11, %s4186_s11 }
   0x9   :  { %p4193_p3 = por %p4192_p2, %p4191_p1 }
   0xb   :  { %p4194_p4 = pnand %p4193_p3, %p4187_p0 }
   0xd   :  { %4197 = shalt.err (!%p4194_p4)
}
   0xe   :  { %38 = dma.hbm_to_vmem [thread:$0]  %s5768_s1, 128, %s36_s10, [#allocation6]  }
   0xf   :  { %s4329_s14 = smov [#allocation8]   ;;  %s4330_s16 = smov [#allocation2]  }
  0x10   :  { %s56_s15 = sshll.u32 %s4329_s14, 4  ;;  %s25_s17 = sshll.u32 %s4330_s16, 4  ;;  %s57_s15 = int_to_ptr.vmem [resolvable:$true] %s56_s15  ;;  %s26_s17 = int_to_ptr.vmem [resolvable:$true] %s25_s17 }
  0x11   :  { %s4206_s18 = scalar_lea.vmem %s57_s15, 2048  ;;  %p4211_p6 = scmp.lt.s32.totalorder %s57_s15, %s57_s15 }
  0x12   :  { %p4207_p5 = scmp.ne.s32.totalorder %s57_s15, %s4206_s18  ;;  %p4212_p7 = scmp.lt.s32.totalorder %s4206_s18, %s4206_s18 }
  0x14   :  { %p4213_p8 = por %p4212_p7, %p4211_p6 }
  0x16   :  { %p4214_p9 = pnand %p4213_p8, %p4207_p5 }
  0x18   :  { %4217 = shalt.err (!%p4214_p9)
}
  0x19   :  { %s4331_s19 = smov 128   ;;  %s4332_s20 = smov 8  }
  0x1a   :  { %62 = dma.hbm_to_vmem [thread:$0]  %s5770_s3, 2048, %s57_s15, [#allocation9], %s4331_s19, %s4331_s19, %s4332_s20  }
  0x1b   :  { %s4226_s1 = scalar_lea.vmem %s26_s17, 128  ;;  %p4231_p11 = scmp.lt.s32.totalorder %s26_s17, %s26_s17 }
  0x1c   :  { %p4227_p10 = scmp.ne.s32.totalorder %s26_s17, %s4226_s1  ;;  %p4232_p12 = scmp.lt.s32.totalorder %s4226_s1, %s4226_s1 }
  0x1e   :  { %p4233_p13 = por %p4232_p12, %p4231_p11 }
  0x20   :  { %p4234_p0 = pnand %p4233_p13, %p4227_p10 }
  0x22   :  { %4237 = shalt.err (!%p4234_p0)
}
  0x23   :  { %28 = dma.hbm_to_vmem [thread:$0]  %s5767_s0, 128, %s26_s17, [#allocation3]  }
  0x24   :  { %s4333_s25 = smov [#allocation7]   ;;  %s4334_s27 = smov [#allocation10]  }
  0x25   :  { %s44_s26 = sshll.u32 %s4333_s25, 4  ;;  %s70_s28 = sshll.u32 %s4334_s27, 4  ;;  %s45_s26 = int_to_ptr.vmem [resolvable:$true] %s44_s26  ;;  %s71_s28 = int_to_ptr.vmem [resolvable:$true] %s70_s28 }
  0x26   :  { %s4246_s29 = scalar_lea.vmem %s45_s26, 2048  ;;  %p4251_p2 = scmp.lt.s32.totalorder %s45_s26, %s45_s26 }
  0x27   :  { %p4247_p1 = scmp.ne.s32.totalorder %s45_s26, %s4246_s29  ;;  %p4252_p3 = scmp.lt.s32.totalorder %s4246_s29, %s4246_s29 }
  0x29   :  { %p4253_p4 = por %p4252_p3, %p4251_p2 }
  0x2b   :  { %p4254_p5 = pnand %p4253_p4, %p4247_p1 }
  0x2d   :  { %4257 = shalt.err (!%p4254_p5)
}
  0x2e   :  { %50 = dma.hbm_to_vmem [thread:$0]  %s5769_s2, 2048, %s45_s26, [#allocation6], %s4331_s19, %s4331_s19, %s4332_s20  }
  0x2f   :  { %s4266_s0 = scalar_lea.vmem %s71_s28, 2048  ;;  %p4271_p7 = scmp.lt.s32.totalorder %s71_s28, %s71_s28 }
  0x30   :  { %p4267_p6 = scmp.ne.s32.totalorder %s71_s28, %s4266_s0  ;;  %p4272_p8 = scmp.lt.s32.totalorder %s4266_s0, %s4266_s0 }
  0x32   :  { %p4273_p9 = por %p4272_p8, %p4271_p7 }
  0x34   :  { %p4274_p10 = pnand %p4273_p9, %p4267_p6 }
  0x36   :  { %4277 = shalt.err (!%p4274_p10)
}
  0x37   :  { %76 = dma.hbm_to_vmem [thread:$0]  %s5772_s5, 2048, %s71_s28, [#allocation9], %s4331_s19, %s4331_s19, %s4332_s20  }
  0x38   :  { %s4335_s12 = smov [#allocation11]  }
  0x39   :  { %s84_s13 = sshll.u32 %s4335_s12, 4  ;;  %s85_s13 = int_to_ptr.vmem [resolvable:$true] %s84_s13 }
  0x3a   :  { %s4286_s14 = scalar_lea.vmem %s85_s13, 2048  ;;  %p4291_p12 = scmp.lt.s32.totalorder %s85_s13, %s85_s13 }
  0x3b   :  { %p4287_p11 = scmp.ne.s32.totalorder %s85_s13, %s4286_s14  ;;  %p4292_p13 = scmp.lt.s32.totalorder %s4286_s14, %s4286_s14 }
  0x3d   :  { %p4293_p0 = por %p4292_p13, %p4291_p12 }
  0x3f   :  { %p4294_p1 = pnand %p4293_p0, %p4287_p11 }
  0x41   :  { %4297 = shalt.err (!%p4294_p1)
}
  0x42   :  { %90 = dma.hbm_to_vmem [thread:$0]  %s5774_s7, 2048, %s85_s13, [#allocation12], %s4331_s19, %s4331_s19, %s4332_s20  }
  0x43   :  { %4318 = dma.done.wait [#allocation3], 128  }
  0x44   :  { %4319 = vsyncadd [#allocation3], 4294967168 }
  0x45   :  { %4320 = dma.done.wait [#allocation6], 2176  }
  0x46   :  { %4321 = vsyncadd [#allocation6], 4294965120 }
  0x47   :  { %4322 = dma.done.wait [#allocation9], 4096  }
  0x48   :  { %4323 = vsyncadd [#allocation9], 4294963200 }
  0x49   :  { %4324 = dma.done.wait [#allocation12], 2048  }
  0x4a   :  { %4325 = vsyncadd [#allocation12], 4294965248  ;;  %v4336_v0 = vmov 0.0   ;;  %vm4337_vm0 = vmmov 0   ;;  %v177_v1 = vld [vmem:[#allocation7 + $0x78] sm:$0xff]  ;;  %v176_v3 = vld [vmem:[#allocation7 + $0x70] sm:$0xff] }
  0x4b   :  { %3015 = vmatprep.subr.mxu0 %v4336_v0  ;;  %3050 = vmatprep.subr.mxu1 %v4336_v0  ;;  %v4425_v2 = vld [vmem:[#allocation8 + $0x78] sm:$0xff]  ;;  %v4428_v4 = vld [vmem:[#allocation8 + $0x70] sm:$0xff]  ;;  %v175_v5 = vld [vmem:[#allocation7 + $0x68] sm:$0xff] }
  0x4c   :  { %3047 = vmatprep.mubr.msk.f32.mxu0 %vm4337_vm0, %v4336_v0  ;;  %3082 = vmatprep.mubr.msk.f32.mxu1 %vm4337_vm0, %v4336_v0  ;;  %v4432_v6 = vld [vmem:[#allocation8 + $0x68] sm:$0xff]  ;;  %v174_v7 = vld [vmem:[#allocation7 + $0x60] sm:$0xff]  ;;  %v173_v9 = vld [vmem:[#allocation7 + $0x58] sm:$0xff] }
  0x4d   :  { %3016 = vmatpush3.msra.mxu0 %v177_v1  ;;  %3051 = vmatpush3.msra.mxu1 %v4425_v2  ;;  %v4437_v8 = vld [vmem:[#allocation8 + $0x60] sm:$0xff]  ;;  %v4442_v10 = vld [vmem:[#allocation8 + $0x58] sm:$0xff]  ;;  %v172_v11 = vld [vmem:[#allocation7 + $0x50] sm:$0xff]  ;;  %v334_v1 = vlaneseq }
  0x4e   :  { %3017 = vmatprep.subr.mxu0 %v4336_v0  ;;  %3052 = vmatprep.subr.mxu1 %v4336_v0  ;;  %v4447_v12 = vld [vmem:[#allocation8 + $0x50] sm:$0xff]  ;;  %v171_v13 = vld [vmem:[#allocation7 + $0x48] sm:$0xff]  ;;  %v170_v15 = vld [vmem:[#allocation7 + $0x40] sm:$0xff] }
  0x4f   :  { %3018 = vmatpush3.msra.mxu0 %v176_v3  ;;  %3053 = vmatpush3.msra.mxu1 %v4428_v4  ;;  %v4452_v14 = vld [vmem:[#allocation8 + $0x48] sm:$0xff]  ;;  %v4457_v16 = vld [vmem:[#allocation8 + $0x40] sm:$0xff]  ;;  %v169_v17 = vld [vmem:[#allocation7 + $0x38] sm:$0xff]  ;;  %v4628_v3 = vshrl.u32 %v334_v1, 7 }
  0x50   :  { %3019 = vmatprep.subr.mxu0 %v4336_v0  ;;  %3054 = vmatprep.subr.mxu1 %v4336_v0  ;;  %v4462_v18 = vld [vmem:[#allocation8 + $0x38] sm:$0xff]  ;;  %v168_v19 = vld [vmem:[#allocation7 + $0x30] sm:$0xff]  ;;  %v167_v21 = vld [vmem:[#allocation7 + $0x28] sm:$0xff] }
  0x51   :  { %3020 = vmatpush3.msra.mxu0 %v175_v5  ;;  %3055 = vmatpush3.msra.mxu1 %v4432_v6  ;;  %v4467_v20 = vld [vmem:[#allocation8 + $0x30] sm:$0xff]  ;;  %v4472_v22 = vld [vmem:[#allocation8 + $0x28] sm:$0xff]  ;;  %v166_v23 = vld [vmem:[#allocation7 + $0x20] sm:$0xff]  ;;  %v336_v5 = vsub.s32 1, %v4628_v3 }
  0x52   :  { %3021 = vmatprep.subr.mxu0 %v4336_v0  ;;  %3056 = vmatprep.subr.mxu1 %v4336_v0  ;;  %v4477_v24 = vld [vmem:[#allocation8 + $0x20] sm:$0xff]  ;;  %v165_v25 = vld [vmem:[#allocation7 + $0x18] sm:$0xff]  ;;  %v164_v27 = vld [vmem:[#allocation7 + $0x10] sm:$0xff] }
  0x53   :  { %3022 = vmatpush3.msra.mxu0 %v174_v7  ;;  %3057 = vmatpush3.msra.mxu1 %v4437_v8  ;;  %v4482_v26 = vld [vmem:[#allocation8 + $0x18] sm:$0xff]  ;;  %v4487_v28 = vld [vmem:[#allocation8 + $0x10] sm:$0xff]  ;;  %v163_v29 = vld [vmem:[#allocation7 + $0x8] sm:$0xff] }
  0x54   :  { %3023 = vmatprep.subr.mxu0 %v4336_v0  ;;  %3058 = vmatprep.subr.mxu1 %v4336_v0  ;;  %v4492_v30 = vld [vmem:[#allocation8 + $0x8] sm:$0xff]  ;;  %v162_v31 = vld [vmem:[#allocation7] sm:$0xff]  ;;  %v161_v33 = vld [vmem:[#allocation2] sm:$0xff] }
  0x55   :  { %3024 = vmatpush3.msra.mxu0 %v173_v9  ;;  %3059 = vmatpush3.msra.mxu1 %v4442_v10  ;;  %v4497_v32 = vld [vmem:[#allocation8] sm:$0xff]  ;;  %v4500_v34 = vld [vmem:[#allocation5] sm:$0xff]  ;;  %v4509_v36 = vld [vmem:[#allocation10 + $0x70] sm:$0xff] }
  0x56   :  { %3025 = vmatprep.subr.mxu0 %v4336_v0  ;;  %3060 = vmatprep.subr.mxu1 %v4336_v0  ;;  %v4505_v35 = vld [vmem:[#allocation10 + $0x78] sm:$0xff]  ;;  %v4516_v37 = vld [vmem:[#allocation10 + $0x68] sm:$0xff]  ;;  %v4522_v38 = vld [vmem:[#allocation10 + $0x60] sm:$0xff] }
  0x57   :  { %3026 = vmatpush3.msra.mxu0 %v172_v11  ;;  %3061 = vmatpush3.msra.mxu1 %v4447_v12  ;;  %v4526_v39 = vld [vmem:[#allocation10 + $0x58] sm:$0xff]  ;;  %v4530_v40 = vld [vmem:[#allocation10 + $0x50] sm:$0xff]  ;;  %v4534_v41 = vld [vmem:[#allocation10 + $0x48] sm:$0xff] }
  0x58   :  { %3027 = vmatprep.subr.mxu0 %v4336_v0  ;;  %3062 = vmatprep.subr.mxu1 %v4336_v0  ;;  %v4538_v42 = vld [vmem:[#allocation10 + $0x40] sm:$0xff]  ;;  %v4542_v43 = vld [vmem:[#allocation10 + $0x38] sm:$0xff]  ;;  %v4546_v44 = vld [vmem:[#allocation10 + $0x30] sm:$0xff] }
  0x59   :  { %3028 = vmatpush3.msra.mxu0 %v171_v13  ;;  %3063 = vmatpush3.msra.mxu1 %v4452_v14  ;;  %v4550_v45 = vld [vmem:[#allocation10 + $0x28] sm:$0xff]  ;;  %v4554_v46 = vld [vmem:[#allocation10 + $0x20] sm:$0xff]  ;;  %v4560_v47 = vld [vmem:[#allocation10 + $0x18] sm:$0xff] }
  0x5a   :  { %3029 = vmatprep.subr.mxu0 %v4336_v0  ;;  %3064 = vmatprep.subr.mxu1 %v4336_v0  ;;  %v4564_v48 = vld [vmem:[#allocation10 + $0x10] sm:$0xff]  ;;  %v4568_v49 = vld [vmem:[#allocation10 + $0x8] sm:$0xff]  ;;  %v4572_v50 = vld [vmem:[#allocation10] sm:$0xff] }
  0x5b   :  { %3030 = vmatpush3.msra.mxu0 %v170_v15  ;;  %3065 = vmatpush3.msra.mxu1 %v4457_v16  ;;  %v4575_v51 = vld [vmem:[#allocation11 + $0x78] sm:$0xff]  ;;  %v4577_v52 = vld [vmem:[#allocation11 + $0x70] sm:$0xff]  ;;  %v4582_v53 = vld [vmem:[#allocation11 + $0x68] sm:$0xff] }
  0x5c   :  { %3031 = vmatprep.subr.mxu0 %v4336_v0  ;;  %3066 = vmatprep.subr.mxu1 %v4336_v0  ;;  %v4586_v54 = vld [vmem:[#allocation11 + $0x60] sm:$0xff]  ;;  %v4590_v55 = vld [vmem:[#allocation11 + $0x58] sm:$0xff]  ;;  %v4594_v56 = vld [vmem:[#allocation11 + $0x50] sm:$0xff] }
  0x5d   :  { %3032 = vmatpush3.msra.mxu0 %v169_v17  ;;  %3067 = vmatpush3.msra.mxu1 %v4462_v18  ;;  %v4598_v57 = vld [vmem:[#allocation11 + $0x48] sm:$0xff]  ;;  %v4602_v58 = vld [vmem:[#allocation11 + $0x40] sm:$0xff]  ;;  %v4606_v59 = vld [vmem:[#allocation11 + $0x38] sm:$0xff] }
  0x5e   :  { %3033 = vmatprep.subr.mxu0 %v4336_v0  ;;  %3068 = vmatprep.subr.mxu1 %v4336_v0  ;;  %v4610_v60 = vld [vmem:[#allocation11 + $0x30] sm:$0xff]  ;;  %v4614_v61 = vld [vmem:[#allocation11 + $0x28] sm:$0xff]  ;;  %v4618_v62 = vld [vmem:[#allocation11 + $0x20] sm:$0xff] }
  0x5f   :  { %3034 = vmatpush3.msra.mxu0 %v168_v19  ;;  %3069 = vmatpush3.msra.mxu1 %v4467_v20  ;;  %v4622_v63 = vld [vmem:[#allocation11 + $0x18] sm:$0xff] }
  0x60   :  { %3035 = vmatprep.subr.mxu0 %v4336_v0  ;;  %3070 = vmatprep.subr.mxu1 %v4336_v0  ;;  %v4634_v7 = vld [vmem:[%s5771_s4 + $0x8] sm:$0x3] }
  0x61   :  { %3036 = vmatpush3.msra.mxu0 %v167_v21  ;;  %3071 = vmatpush3.msra.mxu1 %v4472_v22  ;;  %v337_v9 = vrot.slane %v4634_v7, %v336_v5 }
  0x62   :  { %3037 = vmatprep.subr.mxu0 %v4336_v0  ;;  %3072 = vmatprep.subr.mxu1 %v4336_v0 }
  0x63   :  { %3038 = vmatpush3.msra.mxu0 %v166_v23  ;;  %3073 = vmatpush3.msra.mxu1 %v4477_v24 }
  0x64   :  { %3039 = vmatprep.subr.mxu0 %v4336_v0  ;;  %3074 = vmatprep.subr.mxu1 %v4336_v0 }
  0x65   :  { %3040 = vmatpush3.msra.mxu0 %v165_v25  ;;  %3075 = vmatpush3.msra.mxu1 %v4482_v26  ;;  %v4676_v25 = vld [vmem:[#allocation11 + $0x10] sm:$0xff] }
  0x66   :  { %3041 = vmatprep.subr.mxu0 %v4336_v0  ;;  %3076 = vmatprep.subr.mxu1 %v4336_v0 }
  0x67   :  { %3042 = vmatpush3.msra.mxu0 %v164_v27  ;;  %3077 = vmatpush3.msra.mxu1 %v4487_v28  ;;  %v4680_v27 = vld [vmem:[#allocation11 + $0x8] sm:$0xff] }
  0x68   :  { %3043 = vmatprep.subr.mxu0 %v4336_v0  ;;  %3078 = vmatprep.subr.mxu1 %v4336_v0 }
  0x69   :  { %3044 = vmatpush3.msra.mxu0 %v163_v29  ;;  %3079 = vmatpush3.msra.mxu1 %v4492_v30  ;;  %v4684_v29 = vld [vmem:[#allocation11] sm:$0xff] }
  0x6a   :  { %3045 = vmatprep.subr.mxu0 %v4336_v0  ;;  %3080 = vmatprep.subr.mxu1 %v4336_v0 }
  0x6b   :  { %3046 = vmatpush3.msra.mxu0 %v162_v31  ;;  %3081 = vmatpush3.msra.mxu1 %v4497_v32  ;;  %v4691_v31 = vld [vmem:[%s5773_s6] ss:$0 sm:$0xff] }
  0x6c   :  { %3048 = vmatmul.mubr.f32.vlgmr.msra.gmra.mxu0 %v161_v33  ;;  %3083 = vmatmul.mubr.f32.vlgmr.msra.gmra.mxu1 %v4500_v34 }
  0x6d   :  { %3085 = vmatprep.subr.mxu0 %v4336_v0  ;;  %3117 = vmatprep.mubr.msk.f32.mxu0 %vm4337_vm0, %v4336_v0 }
  0x6e   :  { %3086 = vmatpush3.msra.mxu0 %v4505_v35  ;;  %3120 = vmatprep.subr.mxu1 %v4336_v0 }
  0x6f   :  { %3087 = vmatprep.subr.mxu0 %v4336_v0  ;;  %3152 = vmatprep.mubr.msk.f32.mxu1 %vm4337_vm0, %v4336_v0 }
  0x70   :  { %3088 = vmatpush3.msra.mxu0 %v4509_v36  ;;  %3121 = vmatpush3.msra.mxu1 %v4575_v51 }
  0x71   :  { %3089 = vmatprep.subr.mxu0 %v4336_v0  ;;  %3122 = vmatprep.subr.mxu1 %v4336_v0 }
  0x72   :  { %3090 = vmatpush3.msra.mxu0 %v4516_v37  ;;  %3123 = vmatpush3.msra.mxu1 %v4577_v52 }
  0x73   :  { %3091 = vmatprep.subr.mxu0 %v4336_v0  ;;  %3124 = vmatprep.subr.mxu1 %v4336_v0 }
  0x74   :  { %3092 = vmatpush3.msra.mxu0 %v4522_v38  ;;  %3125 = vmatpush3.msra.mxu1 %v4582_v53 }
  0x75   :  { %3093 = vmatprep.subr.mxu0 %v4336_v0  ;;  %3126 = vmatprep.subr.mxu1 %v4336_v0 }
  0x76   :  { %3094 = vmatpush3.msra.mxu0 %v4526_v39  ;;  %3127 = vmatpush3.msra.mxu1 %v4586_v54 }
  0x77   :  { %3095 = vmatprep.subr.mxu0 %v4336_v0  ;;  %3128 = vmatprep.subr.mxu1 %v4336_v0 }
  0x78   :  { %3096 = vmatpush3.msra.mxu0 %v4530_v40  ;;  %3129 = vmatpush3.msra.mxu1 %v4590_v55 }
  0x79   :  { %3097 = vmatprep.subr.mxu0 %v4336_v0  ;;  %3130 = vmatprep.subr.mxu1 %v4336_v0 }
  0x7a   :  { %3098 = vmatpush3.msra.mxu0 %v4534_v41  ;;  %3131 = vmatpush3.msra.mxu1 %v4594_v56 }
  0x7b   :  { %3099 = vmatprep.subr.mxu0 %v4336_v0  ;;  %3132 = vmatprep.subr.mxu1 %v4336_v0 }
  0x7c   :  { %3100 = vmatpush3.msra.mxu0 %v4538_v42  ;;  %3133 = vmatpush3.msra.mxu1 %v4598_v57 }
  0x7d   :  { %3101 = vmatprep.subr.mxu0 %v4336_v0  ;;  %3134 = vmatprep.subr.mxu1 %v4336_v0 }
  0x7e   :  { %3102 = vmatpush3.msra.mxu0 %v4542_v43  ;;  %3135 = vmatpush3.msra.mxu1 %v4602_v58 }
  0x7f   :  { %3103 = vmatprep.subr.mxu0 %v4336_v0  ;;  %3136 = vmatprep.subr.mxu1 %v4336_v0 }
  0x80   :  { %3104 = vmatpush3.msra.mxu0 %v4546_v44  ;;  %3137 = vmatpush3.msra.mxu1 %v4606_v59 }
  0x81   :  { %3105 = vmatprep.subr.mxu0 %v4336_v0  ;;  %3138 = vmatprep.subr.mxu1 %v4336_v0 }
  0x82   :  { %3106 = vmatpush3.msra.mxu0 %v4550_v45  ;;  %3139 = vmatpush3.msra.mxu1 %v4610_v60 }
  0x83   :  { %3107 = vmatprep.subr.mxu0 %v4336_v0  ;;  %3140 = vmatprep.subr.mxu1 %v4336_v0 }
  0x84   :  { %3108 = vmatpush3.msra.mxu0 %v4554_v46  ;;  %3141 = vmatpush3.msra.mxu1 %v4614_v61 }
  0x85   :  { %3109 = vmatprep.subr.mxu0 %v4336_v0  ;;  %3142 = vmatprep.subr.mxu1 %v4336_v0 }
  0x86   :  { %3110 = vmatpush3.msra.mxu0 %v4560_v47  ;;  %3143 = vmatpush3.msra.mxu1 %v4618_v62 }
  0x87   :  { %3111 = vmatprep.subr.mxu0 %v4336_v0  ;;  %3144 = vmatprep.subr.mxu1 %v4336_v0 }
  0x88   :  { %3112 = vmatpush3.msra.mxu0 %v4564_v48  ;;  %3145 = vmatpush3.msra.mxu1 %v4622_v63 }
  0x89   :  { %3113 = vmatprep.subr.mxu0 %v4336_v0  ;;  %3146 = vmatprep.subr.mxu1 %v4336_v0 }
  0x8a   :  { %3114 = vmatpush3.msra.mxu0 %v4568_v49  ;;  %3147 = vmatpush3.msra.mxu1 %v4676_v25 }
  0x8b   :  { %3115 = vmatprep.subr.mxu0 %v4336_v0  ;;  %3148 = vmatprep.subr.mxu1 %v4336_v0 }
  0x8c   :  { %3116 = vmatpush3.msra.mxu0 %v4572_v50  ;;  %3149 = vmatpush3.msra.mxu1 %v4680_v27 }
  0x8d   :  { %3155 = vmatprep.subr.mxu0 %v4336_v0  ;;  %3150 = vmatprep.subr.mxu1 %v4336_v0 }
  0x8e   :  { %3151 = vmatpush3.msra.mxu1 %v4684_v29 }
  0x8f   :  { %3190 = vmatprep.subr.mxu1 %v4336_v0 }
 0x12c   :  { %v4639_v11 = vpop.f32.mrf.mxu0  ;;  %v329_v13 = vpop.f32.mrf.mxu1 }
 0x12d   :  { %v333_v15 = vadd.f32 %v329_v13, %v4639_v11 }
 0x12e   :  { %v3049_v17 = vpop.f32.mrf.mxu0  ;;  %v3084_v19 = vpop.f32.mrf.mxu1 }
 0x12f   :  { %v338_v21 = vadd.f32 %v337_v9, %v333_v15  ;;  %v4731_v15 = vld [vmem:[%s5775_s8] ss:$0 sm:$0xff] }
 0x131   :  { %v339_v23 = vmax.f32 %v338_v21, 0.0 }
 0x133   :  { %3118 = vmatmul.mubr.f32.vlgmr.msra.gmra.mxu0 %v339_v23 }
 0x134   :  { %3156 = vmatpush3.msra.mxu0 %v4425_v2  ;;  %3187 = vmatprep.mubr.msk.f32.mxu0 %vm4337_vm0, %v4336_v0 }
 0x135   :  { %3157 = vmatprep.subr.mxu0 %v4336_v0 }
 0x136   :  { %3158 = vmatpush3.msra.mxu0 %v4428_v4 }
 0x137   :  { %3159 = vmatprep.subr.mxu0 %v4336_v0 }
 0x138   :  { %3160 = vmatpush3.msra.mxu0 %v4432_v6 }
 0x139   :  { %3161 = vmatprep.subr.mxu0 %v4336_v0 }
 0x13a   :  { %3162 = vmatpush3.msra.mxu0 %v4437_v8 }
 0x13b   :  { %3163 = vmatprep.subr.mxu0 %v4336_v0 }
 0x13c   :  { %3164 = vmatpush3.msra.mxu0 %v4442_v10 }
 0x13d   :  { %3165 = vmatprep.subr.mxu0 %v4336_v0 }
 0x13e   :  { %3166 = vmatpush3.msra.mxu0 %v4447_v12 }
 0x13f   :  { %3167 = vmatprep.subr.mxu0 %v4336_v0 }
 0x140   :  { %3168 = vmatpush3.msra.mxu0 %v4452_v14 }
 0x141   :  { %3169 = vmatprep.subr.mxu0 %v4336_v0 }
 0x142   :  { %3170 = vmatpush3.msra.mxu0 %v4457_v16 }
 0x143   :  { %3171 = vmatprep.subr.mxu0 %v4336_v0 }
 0x144   :  { %3172 = vmatpush3.msra.mxu0 %v4462_v18 }
 0x145   :  { %3173 = vmatprep.subr.mxu0 %v4336_v0 }
 0x146   :  { %3174 = vmatpush3.msra.mxu0 %v4467_v20 }
 0x147   :  { %3175 = vmatprep.subr.mxu0 %v4336_v0 }
 0x148   :  { %3176 = vmatpush3.msra.mxu0 %v4472_v22 }
 0x149   :  { %3177 = vmatprep.subr.mxu0 %v4336_v0 }
 0x14a   :  { %3178 = vmatpush3.msra.mxu0 %v4477_v24 }
 0x14b   :  { %3179 = vmatprep.subr.mxu0 %v4336_v0 }
 0x14c   :  { %3180 = vmatpush3.msra.mxu0 %v4482_v26 }
 0x14d   :  { %3181 = vmatprep.subr.mxu0 %v4336_v0 }
 0x14e   :  { %3182 = vmatpush3.msra.mxu0 %v4487_v28 }
 0x14f   :  { %3183 = vmatprep.subr.mxu0 %v4336_v0 }
 0x150   :  { %3184 = vmatpush3.msra.mxu0 %v4492_v30 }
 0x151   :  { %3185 = vmatprep.subr.mxu0 %v4336_v0 }
 0x152   :  { %3186 = vmatpush3.msra.mxu0 %v4497_v32 }
 0x153   :  { %3225 = vmatprep.subr.mxu0 %v4336_v0 }
 0x1f3   :  { %v406_v33 = vpop.f32.mrf.mxu0 }
 0x1f4   :  { %v407_v1 = vadd.f32 %v4691_v31, %v406_v33 }
 0x1f5   :  { %v3119_v9 = vpop.f32.mrf.mxu0 }
 0x1f6   :  { %v410_v13 = vmax.f32 %v407_v1, 0.0 }
 0x1f8   :  { %3153 = vmatmul.mubr.f32.vlgmr.msra.gmra.mxu1 %v410_v13 }
 0x1f9   :  { %3191 = vmatpush3.msra.mxu1 %v4505_v35  ;;  %3222 = vmatprep.mubr.msk.f32.mxu1 %vm4337_vm0, %v4336_v0 }
 0x1fa   :  { %3192 = vmatprep.subr.mxu1 %v4336_v0 }
 0x1fb   :  { %3193 = vmatpush3.msra.mxu1 %v4509_v36 }
 0x1fc   :  { %3194 = vmatprep.subr.mxu1 %v4336_v0 }
 0x1fd   :  { %3195 = vmatpush3.msra.mxu1 %v4516_v37 }
 0x1fe   :  { %3196 = vmatprep.subr.mxu1 %v4336_v0 }
 0x1ff   :  { %3197 = vmatpush3.msra.mxu1 %v4522_v38 }
 0x200   :  { %3198 = vmatprep.subr.mxu1 %v4336_v0 }
 0x201   :  { %3199 = vmatpush3.msra.mxu1 %v4526_v39 }
 0x202   :  { %3200 = vmatprep.subr.mxu1 %v4336_v0 }
 0x203   :  { %3201 = vmatpush3.msra.mxu1 %v4530_v40 }
 0x204   :  { %3202 = vmatprep.subr.mxu1 %v4336_v0 }
 0x205   :  { %3203 = vmatpush3.msra.mxu1 %v4534_v41 }
 0x206   :  { %3204 = vmatprep.subr.mxu1 %v4336_v0 }
 0x207   :  { %3205 = vmatpush3.msra.mxu1 %v4538_v42 }
 0x208   :  { %3206 = vmatprep.subr.mxu1 %v4336_v0 }
 0x209   :  { %3207 = vmatpush3.msra.mxu1 %v4542_v43 }
 0x20a   :  { %3208 = vmatprep.subr.mxu1 %v4336_v0 }
 0x20b   :  { %3209 = vmatpush3.msra.mxu1 %v4546_v44 }
 0x20c   :  { %3210 = vmatprep.subr.mxu1 %v4336_v0 }
 0x20d   :  { %3211 = vmatpush3.msra.mxu1 %v4550_v45 }
 0x20e   :  { %3212 = vmatprep.subr.mxu1 %v4336_v0 }
 0x20f   :  { %3213 = vmatpush3.msra.mxu1 %v4554_v46 }
 0x210   :  { %3214 = vmatprep.subr.mxu1 %v4336_v0 }
 0x211   :  { %3215 = vmatpush3.msra.mxu1 %v4560_v47 }
 0x212   :  { %3216 = vmatprep.subr.mxu1 %v4336_v0 }
 0x213   :  { %3217 = vmatpush3.msra.mxu1 %v4564_v48 }
 0x214   :  { %3218 = vmatprep.subr.mxu1 %v4336_v0 }
 0x215   :  { %3219 = vmatpush3.msra.mxu1 %v4568_v49 }
 0x216   :  { %3220 = vmatprep.subr.mxu1 %v4336_v0 }
 0x217   :  { %3221 = vmatpush3.msra.mxu1 %v4572_v50 }
 0x218   :  { %3260 = vmatprep.subr.mxu1 %v4336_v0 }
 0x2b8   :  { %v477_v17 = vpop.f32.mrf.mxu1 }
 0x2b9   :  { %v478_v19 = vadd.f32 %v4731_v15, %v477_v17 }
 0x2ba   :  { %v3154_v21 = vpop.f32.mrf.mxu1 }
 0x2bb   :  { %v482_v23 = vmul.f32 0.1, %v478_v19 }
 0x2bd   :  { %v4735_v33 = vsub.f32 %v4500_v34, %v482_v23  ;;  %v557_v34 = vsub.s32 0, %v4628_v3 }
 0x2bf   :  { %3188 = vmatmul.mubr.f32.vlgmr.msra.gmra.mxu0 %v4735_v33  ;;  %v558_v1 = vrot.slane %v4634_v7, %v557_v34 }
 0x2c0   :  { %3226 = vmatpush3.msra.mxu0 %v4575_v51  ;;  %3257 = vmatprep.mubr.msk.f32.mxu0 %vm4337_vm0, %v4336_v0 }
 0x2c1   :  { %3227 = vmatprep.subr.mxu0 %v4336_v0 }
 0x2c2   :  { %3228 = vmatpush3.msra.mxu0 %v4577_v52 }
 0x2c3   :  { %3229 = vmatprep.subr.mxu0 %v4336_v0 }
 0x2c4   :  { %3230 = vmatpush3.msra.mxu0 %v4582_v53 }
 0x2c5   :  { %3231 = vmatprep.subr.mxu0 %v4336_v0 }
 0x2c6   :  { %3232 = vmatpush3.msra.mxu0 %v4586_v54 }
 0x2c7   :  { %3233 = vmatprep.subr.mxu0 %v4336_v0 }
 0x2c8   :  { %3234 = vmatpush3.msra.mxu0 %v4590_v55 }
 0x2c9   :  { %3235 = vmatprep.subr.mxu0 %v4336_v0 }
 0x2ca   :  { %3236 = vmatpush3.msra.mxu0 %v4594_v56 }
 0x2cb   :  { %3237 = vmatprep.subr.mxu0 %v4336_v0 }
 0x2cc   :  { %3238 = vmatpush3.msra.mxu0 %v4598_v57 }
 0x2cd   :  { %3239 = vmatprep.subr.mxu0 %v4336_v0 }
 0x2ce   :  { %3240 = vmatpush3.msra.mxu0 %v4602_v58 }
 0x2cf   :  { %3241 = vmatprep.subr.mxu0 %v4336_v0 }
 0x2d0   :  { %3242 = vmatpush3.msra.mxu0 %v4606_v59 }
 0x2d1   :  { %3243 = vmatprep.subr.mxu0 %v4336_v0 }
 0x2d2   :  { %3244 = vmatpush3.msra.mxu0 %v4610_v60 }
 0x2d3   :  { %3245 = vmatprep.subr.mxu0 %v4336_v0 }
 0x2d4   :  { %3246 = vmatpush3.msra.mxu0 %v4614_v61 }
 0x2d5   :  { %3247 = vmatprep.subr.mxu0 %v4336_v0 }
 0x2d6   :  { %3248 = vmatpush3.msra.mxu0 %v4618_v62 }
 0x2d7   :  { %3249 = vmatprep.subr.mxu0 %v4336_v0 }
 0x2d8   :  { %3250 = vmatpush3.msra.mxu0 %v4622_v63 }
 0x2d9   :  { %3251 = vmatprep.subr.mxu0 %v4336_v0 }
 0x2da   :  { %3252 = vmatpush3.msra.mxu0 %v4676_v25 }
 0x2db   :  { %3253 = vmatprep.subr.mxu0 %v4336_v0 }
 0x2dc   :  { %3254 = vmatpush3.msra.mxu0 %v4680_v27 }
 0x2dd   :  { %3255 = vmatprep.subr.mxu0 %v4336_v0 }
 0x2de   :  { %3256 = vmatpush3.msra.mxu0 %v4684_v29 }
 0x2df   :  { %3295 = vmatprep.subr.mxu0 %v4336_v0 }
 0x37f   :  { %v550_v9 = vpop.f32.mrf.mxu0 }
 0x380   :  { %v554_v13 = vadd.f32 %v550_v9, %v4639_v11 }
 0x381   :  { %v3189_v17 = vpop.f32.mrf.mxu0 }
 0x382   :  { %v559_v19 = vadd.f32 %v558_v1, %v554_v13 }
 0x384   :  { %v560_v21 = vmax.f32 %v559_v19, 0.0 }
 0x386   :  { %3223 = vmatmul.mubr.f32.vlgmr.msra.gmra.mxu1 %v560_v21 }
 0x387   :  { %3261 = vmatpush3.msra.mxu1 %v4425_v2  ;;  %3292 = vmatprep.mubr.msk.f32.mxu1 %vm4337_vm0, %v4336_v0 }
 0x388   :  { %3262 = vmatprep.subr.mxu1 %v4336_v0 }
 0x389   :  { %3263 = vmatpush3.msra.mxu1 %v4428_v4 }
 0x38a   :  { %3264 = vmatprep.subr.mxu1 %v4336_v0 }
 0x38b   :  { %3265 = vmatpush3.msra.mxu1 %v4432_v6 }
 0x38c   :  { %3266 = vmatprep.subr.mxu1 %v4336_v0 }
 0x38d   :  { %3267 = vmatpush3.msra.mxu1 %v4437_v8 }
 0x38e   :  { %3268 = vmatprep.subr.mxu1 %v4336_v0 }
 0x38f   :  { %3269 = vmatpush3.msra.mxu1 %v4442_v10 }
 0x390   :  { %3270 = vmatprep.subr.mxu1 %v4336_v0 }
 0x391   :  { %3271 = vmatpush3.msra.mxu1 %v4447_v12 }
 0x392   :  { %3272 = vmatprep.subr.mxu1 %v4336_v0 }
 0x393   :  { %3273 = vmatpush3.msra.mxu1 %v4452_v14 }
 0x394   :  { %3274 = vmatprep.subr.mxu1 %v4336_v0 }
 0x395   :  { %3275 = vmatpush3.msra.mxu1 %v4457_v16 }
 0x396   :  { %3276 = vmatprep.subr.mxu1 %v4336_v0 }
 0x397   :  { %3277 = vmatpush3.msra.mxu1 %v4462_v18 }
 0x398   :  { %3278 = vmatprep.subr.mxu1 %v4336_v0 }
 0x399   :  { %3279 = vmatpush3.msra.mxu1 %v4467_v20 }
 0x39a   :  { %3280 = vmatprep.subr.mxu1 %v4336_v0 }
 0x39b   :  { %3281 = vmatpush3.msra.mxu1 %v4472_v22 }
 0x39c   :  { %3282 = vmatprep.subr.mxu1 %v4336_v0 }
 0x39d   :  { %3283 = vmatpush3.msra.mxu1 %v4477_v24 }
 0x39e   :  { %3284 = vmatprep.subr.mxu1 %v4336_v0 }
 0x39f   :  { %3285 = vmatpush3.msra.mxu1 %v4482_v26 }
 0x3a0   :  { %3286 = vmatprep.subr.mxu1 %v4336_v0 }
 0x3a1   :  { %3287 = vmatpush3.msra.mxu1 %v4487_v28 }
 0x3a2   :  { %3288 = vmatprep.subr.mxu1 %v4336_v0 }
 0x3a3   :  { %3289 = vmatpush3.msra.mxu1 %v4492_v30 }
 0x3a4   :  { %3290 = vmatprep.subr.mxu1 %v4336_v0 }
 0x3a5   :  { %3291 = vmatpush3.msra.mxu1 %v4497_v32 }
 0x3a6   :  { %3330 = vmatprep.subr.mxu1 %v4336_v0 }
 0x446   :  { %v627_v7 = vpop.f32.mrf.mxu1 }
 0x447   :  { %v628_v23 = vadd.f32 %v4691_v31, %v627_v7 }
 0x448   :  { %v3224_v1 = vpop.f32.mrf.mxu1 }
 0x449   :  { %v631_v9 = vmax.f32 %v628_v23, 0.0  ;;  %v4889_v23 = vld [vmem:[%s5771_s4] sm:$0xff] }
 0x44b   :  { %3258 = vmatmul.mubr.f32.vlgmr.msra.gmra.mxu0 %v631_v9 }
 0x44c   :  { %3296 = vmatpush3.msra.mxu0 %v4505_v35  ;;  %3327 = vmatprep.mubr.msk.f32.mxu0 %vm4337_vm0, %v4336_v0 }
 0x44d   :  { %3297 = vmatprep.subr.mxu0 %v4336_v0 }
 0x44e   :  { %3298 = vmatpush3.msra.mxu0 %v4509_v36 }
 0x44f   :  { %3299 = vmatprep.subr.mxu0 %v4336_v0 }
 0x450   :  { %3300 = vmatpush3.msra.mxu0 %v4516_v37 }
 0x451   :  { %3301 = vmatprep.subr.mxu0 %v4336_v0 }
 0x452   :  { %3302 = vmatpush3.msra.mxu0 %v4522_v38 }
 0x453   :  { %3303 = vmatprep.subr.mxu0 %v4336_v0 }
 0x454   :  { %3304 = vmatpush3.msra.mxu0 %v4526_v39 }
 0x455   :  { %3305 = vmatprep.subr.mxu0 %v4336_v0 }
 0x456   :  { %3306 = vmatpush3.msra.mxu0 %v4530_v40 }
 0x457   :  { %3307 = vmatprep.subr.mxu0 %v4336_v0 }
 0x458   :  { %3308 = vmatpush3.msra.mxu0 %v4534_v41 }
 0x459   :  { %3309 = vmatprep.subr.mxu0 %v4336_v0 }
 0x45a   :  { %3310 = vmatpush3.msra.mxu0 %v4538_v42 }
 0x45b   :  { %3311 = vmatprep.subr.mxu0 %v4336_v0 }
 0x45c   :  { %3312 = vmatpush3.msra.mxu0 %v4542_v43 }
 0x45d   :  { %3313 = vmatprep.subr.mxu0 %v4336_v0 }
 0x45e   :  { %3314 = vmatpush3.msra.mxu0 %v4546_v44 }
 0x45f   :  { %3315 = vmatprep.subr.mxu0 %v4336_v0 }
 0x460   :  { %3316 = vmatpush3.msra.mxu0 %v4550_v45 }
 0x461   :  { %3317 = vmatprep.subr.mxu0 %v4336_v0 }
 0x462   :  { %3318 = vmatpush3.msra.mxu0 %v4554_v46 }
 0x463   :  { %3319 = vmatprep.subr.mxu0 %v4336_v0 }
 0x464   :  { %3320 = vmatpush3.msra.mxu0 %v4560_v47 }
 0x465   :  { %3321 = vmatprep.subr.mxu0 %v4336_v0 }
 0x466   :  { %3322 = vmatpush3.msra.mxu0 %v4564_v48 }
 0x467   :  { %3323 = vmatprep.subr.mxu0 %v4336_v0 }
 0x468   :  { %3324 = vmatpush3.msra.mxu0 %v4568_v49 }
 0x469   :  { %3325 = vmatprep.subr.mxu0 %v4336_v0 }
 0x46a   :  { %3326 = vmatpush3.msra.mxu0 %v4572_v50 }
 0x46b   :  { %3365 = vmatprep.subr.mxu0 %v4336_v0 }
 0x50b   :  { %v698_v13 = vpop.f32.mrf.mxu0 }
 0x50c   :  { %v699_v17 = vadd.f32 %v4731_v15, %v698_v13 }
 0x50d   :  { %v3259_v19 = vpop.f32.mrf.mxu0 }
 0x50e   :  { %v702_v21 = vmul.f32 0.1, %v699_v17 }
 0x510   :  { %v4848_v7 = vsub.f32 %v4735_v33, %v702_v21  ;;  %v777_v33 = vsub.s32 7, %v4628_v3 }
 0x512   :  { %3293 = vmatmul.mubr.f32.vlgmr.msra.gmra.mxu1 %v4848_v7  ;;  %v778_v1 = vrot.slane %v4889_v23, %v777_v33  ;;  %v5010_v33 = vld [vmem:[#allocation8 + $0x70] sm:$0xff] }
 0x513   :  { %3331 = vmatpush3.msra.mxu1 %v4575_v51  ;;  %3362 = vmatprep.mubr.msk.f32.mxu1 %vm4337_vm0, %v4336_v0 }
 0x514   :  { %3332 = vmatprep.subr.mxu1 %v4336_v0 }
 0x515   :  { %3333 = vmatpush3.msra.mxu1 %v4577_v52 }
 0x516   :  { %3334 = vmatprep.subr.mxu1 %v4336_v0 }
 0x517   :  { %3335 = vmatpush3.msra.mxu1 %v4582_v53 }
 0x518   :  { %3336 = vmatprep.subr.mxu1 %v4336_v0 }
 0x519   :  { %3337 = vmatpush3.msra.mxu1 %v4586_v54 }
 0x51a   :  { %3338 = vmatprep.subr.mxu1 %v4336_v0 }
 0x51b   :  { %3339 = vmatpush3.msra.mxu1 %v4590_v55 }
 0x51c   :  { %3340 = vmatprep.subr.mxu1 %v4336_v0 }
 0x51d   :  { %3341 = vmatpush3.msra.mxu1 %v4594_v56 }
 0x51e   :  { %3342 = vmatprep.subr.mxu1 %v4336_v0 }
 0x51f   :  { %3343 = vmatpush3.msra.mxu1 %v4598_v57 }
 0x520   :  { %3344 = vmatprep.subr.mxu1 %v4336_v0 }
 0x521   :  { %3345 = vmatpush3.msra.mxu1 %v4602_v58 }
 0x522   :  { %3346 = vmatprep.subr.mxu1 %v4336_v0 }
 0x523   :  { %3347 = vmatpush3.msra.mxu1 %v4606_v59 }
 0x524   :  { %3348 = vmatprep.subr.mxu1 %v4336_v0 }
 0x525   :  { %3349 = vmatpush3.msra.mxu1 %v4610_v60 }
 0x526   :  { %3350 = vmatprep.subr.mxu1 %v4336_v0 }
 0x527   :  { %3351 = vmatpush3.msra.mxu1 %v4614_v61 }
 0x528   :  { %3352 = vmatprep.subr.mxu1 %v4336_v0 }
 0x529   :  { %3353 = vmatpush3.msra.mxu1 %v4618_v62 }
 0x52a   :  { %3354 = vmatprep.subr.mxu1 %v4336_v0 }
 0x52b   :  { %3355 = vmatpush3.msra.mxu1 %v4622_v63 }
 0x52c   :  { %3356 = vmatprep.subr.mxu1 %v4336_v0 }
 0x52d   :  { %3357 = vmatpush3.msra.mxu1 %v4676_v25 }
 0x52e   :  { %3358 = vmatprep.subr.mxu1 %v4336_v0 }
 0x52f   :  { %3359 = vmatpush3.msra.mxu1 %v4680_v27 }
 0x530   :  { %3360 = vmatprep.subr.mxu1 %v4336_v0 }
 0x531   :  { %3361 = vmatpush3.msra.mxu1 %v4684_v29 }
 0x532   :  { %3400 = vmatprep.subr.mxu1 %v4336_v0 }
 0x5d2   :  { %v770_v9 = vpop.f32.mrf.mxu1 }
 0x5d3   :  { %v774_v13 = vadd.f32 %v770_v9, %v4639_v11  ;;  %v5018_v9 = vld [vmem:[#allocation8 + $0x60] sm:$0xff] }
 0x5d4   :  { %v3294_v17 = vpop.f32.mrf.mxu1 }
 0x5d5   :  { %v779_v19 = vadd.f32 %v778_v1, %v774_v13  ;;  %v5014_v1 = vld [vmem:[#allocation8 + $0x68] sm:$0xff]  ;;  %v5022_v13 = vld [vmem:[#allocation8 + $0x58] sm:$0xff]  ;;  %v5026_v17 = vld [vmem:[#allocation8 + $0x50] sm:$0xff] }
 0x5d7   :  { %v780_v21 = vmax.f32 %v779_v19, 0.0  ;;  %v5030_v19 = vld [vmem:[#allocation8 + $0x48] sm:$0xff] }
 0x5d9   :  { %3328 = vmatmul.mubr.f32.vlgmr.msra.gmra.mxu0 %v780_v21  ;;  %v5034_v21 = vld [vmem:[#allocation8 + $0x40] sm:$0xff] }
 0x5da   :  { %3366 = vmatpush3.msra.mxu0 %v4425_v2  ;;  %3397 = vmatprep.mubr.msk.f32.mxu0 %vm4337_vm0, %v4336_v0 }
 0x5db   :  { %3367 = vmatprep.subr.mxu0 %v4336_v0 }
 0x5dc   :  { %3368 = vmatpush3.msra.mxu0 %v4428_v4 }
 0x5dd   :  { %3369 = vmatprep.subr.mxu0 %v4336_v0 }
 0x5de   :  { %3370 = vmatpush3.msra.mxu0 %v4432_v6 }
 0x5df   :  { %3371 = vmatprep.subr.mxu0 %v4336_v0 }
 0x5e0   :  { %3372 = vmatpush3.msra.mxu0 %v4437_v8 }
 0x5e1   :  { %3373 = vmatprep.subr.mxu0 %v4336_v0 }
 0x5e2   :  { %3374 = vmatpush3.msra.mxu0 %v4442_v10 }
 0x5e3   :  { %3375 = vmatprep.subr.mxu0 %v4336_v0 }
 0x5e4   :  { %3376 = vmatpush3.msra.mxu0 %v4447_v12 }
 0x5e5   :  { %3377 = vmatprep.subr.mxu0 %v4336_v0 }
 0x5e6   :  { %3378 = vmatpush3.msra.mxu0 %v4452_v14 }
 0x5e7   :  { %3379 = vmatprep.subr.mxu0 %v4336_v0 }
 0x5e8   :  { %3380 = vmatpush3.msra.mxu0 %v4457_v16 }
 0x5e9   :  { %3381 = vmatprep.subr.mxu0 %v4336_v0 }
 0x5ea   :  { %3382 = vmatpush3.msra.mxu0 %v4462_v18 }
 0x5eb   :  { %3383 = vmatprep.subr.mxu0 %v4336_v0 }
 0x5ec   :  { %3384 = vmatpush3.msra.mxu0 %v4467_v20  ;;  %v997_v20 = vsub.s32 6, %v4628_v3 }
 0x5ed   :  { %3385 = vmatprep.subr.mxu0 %v4336_v0 }
 0x5ee   :  { %3386 = vmatpush3.msra.mxu0 %v4472_v22  ;;  %v998_v22 = vrot.slane %v4889_v23, %v997_v20 }
 0x5ef   :  { %3387 = vmatprep.subr.mxu0 %v4336_v0 }
 0x5f0   :  { %3388 = vmatpush3.msra.mxu0 %v4477_v24 }
 0x5f1   :  { %3389 = vmatprep.subr.mxu0 %v4336_v0 }
 0x5f2   :  { %3390 = vmatpush3.msra.mxu0 %v4482_v26 }
 0x5f3   :  { %3391 = vmatprep.subr.mxu0 %v4336_v0 }
 0x5f4   :  { %3392 = vmatpush3.msra.mxu0 %v4487_v28 }
 0x5f5   :  { %3393 = vmatprep.subr.mxu0 %v4336_v0 }
 0x5f6   :  { %3394 = vmatpush3.msra.mxu0 %v4492_v30 }
 0x5f7   :  { %3395 = vmatprep.subr.mxu0 %v4336_v0 }
 0x5f8   :  { %3396 = vmatpush3.msra.mxu0 %v4497_v32 }
 0x5f9   :  { %3435 = vmatprep.subr.mxu0 %v4336_v0 }
 0x699   :  { %v847_v2 = vpop.f32.mrf.mxu0 }
 0x69a   :  { %v848_v4 = vadd.f32 %v4691_v31, %v847_v2  ;;  %v5038_v2 = vld [vmem:[#allocation8 + $0x38] sm:$0xff] }
 0x69b   :  { %v3329_v6 = vpop.f32.mrf.mxu0 }
 0x69c   :  { %v851_v8 = vmax.f32 %v848_v4, 0.0  ;;  %v5042_v4 = vld [vmem:[#allocation8 + $0x30] sm:$0xff]  ;;  %v5046_v6 = vld [vmem:[#allocation8 + $0x28] sm:$0xff] }
 0x69e   :  { %3363 = vmatmul.mubr.f32.vlgmr.msra.gmra.mxu1 %v851_v8  ;;  %v5050_v8 = vld [vmem:[#allocation8 + $0x20] sm:$0xff] }
 0x69f   :  { %3401 = vmatpush3.msra.mxu1 %v4505_v35  ;;  %3432 = vmatprep.mubr.msk.f32.mxu1 %vm4337_vm0, %v4336_v0 }
 0x6a0   :  { %3402 = vmatprep.subr.mxu1 %v4336_v0 }
 0x6a1   :  { %3403 = vmatpush3.msra.mxu1 %v4509_v36 }
 0x6a2   :  { %3404 = vmatprep.subr.mxu1 %v4336_v0 }
 0x6a3   :  { %3405 = vmatpush3.msra.mxu1 %v4516_v37 }
 0x6a4   :  { %3406 = vmatprep.subr.mxu1 %v4336_v0 }
 0x6a5   :  { %3407 = vmatpush3.msra.mxu1 %v4522_v38 }
 0x6a6   :  { %3408 = vmatprep.subr.mxu1 %v4336_v0 }
 0x6a7   :  { %3409 = vmatpush3.msra.mxu1 %v4526_v39 }
 0x6a8   :  { %3410 = vmatprep.subr.mxu1 %v4336_v0 }
 0x6a9   :  { %3411 = vmatpush3.msra.mxu1 %v4530_v40 }
 0x6aa   :  { %3412 = vmatprep.subr.mxu1 %v4336_v0 }
 0x6ab   :  { %3413 = vmatpush3.msra.mxu1 %v4534_v41 }
 0x6ac   :  { %3414 = vmatprep.subr.mxu1 %v4336_v0 }
 0x6ad   :  { %3415 = vmatpush3.msra.mxu1 %v4538_v42 }
 0x6ae   :  { %3416 = vmatprep.subr.mxu1 %v4336_v0 }
 0x6af   :  { %3417 = vmatpush3.msra.mxu1 %v4542_v43 }
 0x6b0   :  { %3418 = vmatprep.subr.mxu1 %v4336_v0 }
 0x6b1   :  { %3419 = vmatpush3.msra.mxu1 %v4546_v44 }
 0x6b2   :  { %3420 = vmatprep.subr.mxu1 %v4336_v0 }
 0x6b3   :  { %3421 = vmatpush3.msra.mxu1 %v4550_v45 }
 0x6b4   :  { %3422 = vmatprep.subr.mxu1 %v4336_v0 }
 0x6b5   :  { %3423 = vmatpush3.msra.mxu1 %v4554_v46 }
 0x6b6   :  { %3424 = vmatprep.subr.mxu1 %v4336_v0 }
 0x6b7   :  { %3425 = vmatpush3.msra.mxu1 %v4560_v47 }
 0x6b8   :  { %3426 = vmatprep.subr.mxu1 %v4336_v0 }
 0x6b9   :  { %3427 = vmatpush3.msra.mxu1 %v4564_v48 }
 0x6ba   :  { %3428 = vmatprep.subr.mxu1 %v4336_v0 }
 0x6bb   :  { %3429 = vmatpush3.msra.mxu1 %v4568_v49 }
 0x6bc   :  { %3430 = vmatprep.subr.mxu1 %v4336_v0 }
 0x6bd   :  { %3431 = vmatpush3.msra.mxu1 %v4572_v50 }
 0x6be   :  { %3470 = vmatprep.subr.mxu1 %v4336_v0 }
 0x75e   :  { %v918_v10 = vpop.f32.mrf.mxu1 }
 0x75f   :  { %v919_v12 = vadd.f32 %v4731_v15, %v918_v10  ;;  %v5054_v10 = vld [vmem:[#allocation8 + $0x18] sm:$0xff] }
 0x760   :  { %v3364_v14 = vpop.f32.mrf.mxu1 }
 0x761   :  { %v922_v16 = vmul.f32 0.1, %v919_v12  ;;  %v5058_v12 = vld [vmem:[#allocation8 + $0x10] sm:$0xff]  ;;  %v5062_v14 = vld [vmem:[#allocation8 + $0x8] sm:$0xff] }
 0x763   :  { %v4964_v18 = vsub.f32 %v4848_v7, %v922_v16  ;;  %v5004_v7 = vld [vmem:[#allocation8 + $0x78] sm:$0xff]  ;;  %v5066_v16 = vld [vmem:[#allocation8] sm:$0xff] }
 0x765   :  { %3398 = vmatmul.mubr.f32.vlgmr.msra.gmra.mxu0 %v4964_v18 }
 0x766   :  { %3436 = vmatpush3.msra.mxu0 %v4575_v51  ;;  %3467 = vmatprep.mubr.msk.f32.mxu0 %vm4337_vm0, %v4336_v0 }
 0x767   :  { %3437 = vmatprep.subr.mxu0 %v4336_v0 }
 0x768   :  { %3438 = vmatpush3.msra.mxu0 %v4577_v52 }
 0x769   :  { %3439 = vmatprep.subr.mxu0 %v4336_v0 }
 0x76a   :  { %3440 = vmatpush3.msra.mxu0 %v4582_v53 }
 0x76b   :  { %3441 = vmatprep.subr.mxu0 %v4336_v0 }
 0x76c   :  { %3442 = vmatpush3.msra.mxu0 %v4586_v54 }
 0x76d   :  { %3443 = vmatprep.subr.mxu0 %v4336_v0 }
 0x76e   :  { %3444 = vmatpush3.msra.mxu0 %v4590_v55 }
 0x76f   :  { %3445 = vmatprep.subr.mxu0 %v4336_v0 }
 0x770   :  { %3446 = vmatpush3.msra.mxu0 %v4594_v56 }
 0x771   :  { %3447 = vmatprep.subr.mxu0 %v4336_v0 }
 0x772   :  { %3448 = vmatpush3.msra.mxu0 %v4598_v57 }
 0x773   :  { %3449 = vmatprep.subr.mxu0 %v4336_v0 }
 0x774   :  { %3450 = vmatpush3.msra.mxu0 %v4602_v58 }
 0x775   :  { %3451 = vmatprep.subr.mxu0 %v4336_v0 }
 0x776   :  { %3452 = vmatpush3.msra.mxu0 %v4606_v59 }
 0x777   :  { %3453 = vmatprep.subr.mxu0 %v4336_v0 }
 0x778   :  { %3454 = vmatpush3.msra.mxu0 %v4610_v60 }
 0x779   :  { %3455 = vmatprep.subr.mxu0 %v4336_v0 }
 0x77a   :  { %3456 = vmatpush3.msra.mxu0 %v4614_v61 }
 0x77b   :  { %3457 = vmatprep.subr.mxu0 %v4336_v0 }
 0x77c   :  { %3458 = vmatpush3.msra.mxu0 %v4618_v62 }
 0x77d   :  { %3459 = vmatprep.subr.mxu0 %v4336_v0 }
 0x77e   :  { %3460 = vmatpush3.msra.mxu0 %v4622_v63 }
 0x77f   :  { %3461 = vmatprep.subr.mxu0 %v4336_v0 }
 0x780   :  { %3462 = vmatpush3.msra.mxu0 %v4676_v25 }
 0x781   :  { %3463 = vmatprep.subr.mxu0 %v4336_v0 }
 0x782   :  { %3464 = vmatpush3.msra.mxu0 %v4680_v27 }
 0x783   :  { %3465 = vmatprep.subr.mxu0 %v4336_v0 }
 0x784   :  { %3466 = vmatpush3.msra.mxu0 %v4684_v29 }
 0x785   :  { %3505 = vmatprep.subr.mxu0 %v4336_v0 }
 0x825   :  { %v990_v24 = vpop.f32.mrf.mxu0 }
 0x826   :  { %v994_v26 = vadd.f32 %v990_v24, %v4639_v11 }
 0x827   :  { %v3399_v28 = vpop.f32.mrf.mxu0 }
 0x828   :  { %v999_v30 = vadd.f32 %v998_v22, %v994_v26 }
 0x82a   :  { %v1000_v32 = vmax.f32 %v999_v30, 0.0 }
 0x82c   :  { %3433 = vmatmul.mubr.f32.vlgmr.msra.gmra.mxu1 %v1000_v32 }
 0x82d   :  { %3471 = vmatpush3.msra.mxu1 %v5004_v7  ;;  %3502 = vmatprep.mubr.msk.f32.mxu1 %vm4337_vm0, %v4336_v0 }
 0x82e   :  { %3472 = vmatprep.subr.mxu1 %v4336_v0 }
 0x82f   :  { %3473 = vmatpush3.msra.mxu1 %v5010_v33 }
 0x830   :  { %3474 = vmatprep.subr.mxu1 %v4336_v0 }
 0x831   :  { %3475 = vmatpush3.msra.mxu1 %v5014_v1 }
 0x832   :  { %3476 = vmatprep.subr.mxu1 %v4336_v0 }
 0x833   :  { %3477 = vmatpush3.msra.mxu1 %v5018_v9 }
 0x834   :  { %3478 = vmatprep.subr.mxu1 %v4336_v0 }
 0x835   :  { %3479 = vmatpush3.msra.mxu1 %v5022_v13 }
 0x836   :  { %3480 = vmatprep.subr.mxu1 %v4336_v0 }
 0x837   :  { %3481 = vmatpush3.msra.mxu1 %v5026_v17 }
 0x838   :  { %3482 = vmatprep.subr.mxu1 %v4336_v0 }
 0x839   :  { %3483 = vmatpush3.msra.mxu1 %v5030_v19 }
 0x83a   :  { %3484 = vmatprep.subr.mxu1 %v4336_v0 }
 0x83b   :  { %3485 = vmatpush3.msra.mxu1 %v5034_v21 }
 0x83c   :  { %3486 = vmatprep.subr.mxu1 %v4336_v0 }
 0x83d   :  { %3487 = vmatpush3.msra.mxu1 %v5038_v2 }
 0x83e   :  { %3488 = vmatprep.subr.mxu1 %v4336_v0 }
 0x83f   :  { %3489 = vmatpush3.msra.mxu1 %v5042_v4 }
 0x840   :  { %3490 = vmatprep.subr.mxu1 %v4336_v0 }
 0x841   :  { %3491 = vmatpush3.msra.mxu1 %v5046_v6 }
 0x842   :  { %3492 = vmatprep.subr.mxu1 %v4336_v0 }
 0x843   :  { %3493 = vmatpush3.msra.mxu1 %v5050_v8 }
 0x844   :  { %3494 = vmatprep.subr.mxu1 %v4336_v0 }
 0x845   :  { %3495 = vmatpush3.msra.mxu1 %v5054_v10 }
 0x846   :  { %3496 = vmatprep.subr.mxu1 %v4336_v0 }
 0x847   :  { %3497 = vmatpush3.msra.mxu1 %v5058_v12 }
 0x848   :  { %3498 = vmatprep.subr.mxu1 %v4336_v0 }
 0x849   :  { %3499 = vmatpush3.msra.mxu1 %v5062_v14 }
 0x84a   :  { %3500 = vmatprep.subr.mxu1 %v4336_v0 }
 0x84b   :  { %3501 = vmatpush3.msra.mxu1 %v5066_v16 }
 0x84c   :  { %3540 = vmatprep.subr.mxu1 %v4336_v0 }
 0x8ec   :  { %v1067_v20 = vpop.f32.mrf.mxu1 }
 0x8ed   :  { %v1068_v22 = vadd.f32 %v4691_v31, %v1067_v20  ;;  %v5253_v20 = vld [vmem:[#allocation11 + $0x78] sm:$0xff] }
 0x8ee   :  { %v3434_v24 = vpop.f32.mrf.mxu1 }
 0x8ef   :  { %v1071_v26 = vmax.f32 %v1068_v22, 0.0  ;;  %v5259_v22 = vld [vmem:[#allocation11 + $0x70] sm:$0xff]  ;;  %v5267_v24 = vld [vmem:[#allocation11 + $0x60] sm:$0xff] }
 0x8f1   :  { %3468 = vmatmul.mubr.f32.vlgmr.msra.gmra.mxu0 %v1071_v26  ;;  %v5271_v26 = vld [vmem:[#allocation11 + $0x58] sm:$0xff] }
 0x8f2   :  { %3506 = vmatpush3.msra.mxu0 %v4505_v35  ;;  %3537 = vmatprep.mubr.msk.f32.mxu0 %vm4337_vm0, %v4336_v0 }
 0x8f3   :  { %3507 = vmatprep.subr.mxu0 %v4336_v0 }
 0x8f4   :  { %3508 = vmatpush3.msra.mxu0 %v4509_v36 }
 0x8f5   :  { %3509 = vmatprep.subr.mxu0 %v4336_v0 }
 0x8f6   :  { %3510 = vmatpush3.msra.mxu0 %v4516_v37 }
 0x8f7   :  { %3511 = vmatprep.subr.mxu0 %v4336_v0 }
 0x8f8   :  { %3512 = vmatpush3.msra.mxu0 %v4522_v38 }
 0x8f9   :  { %3513 = vmatprep.subr.mxu0 %v4336_v0 }
 0x8fa   :  { %3514 = vmatpush3.msra.mxu0 %v4526_v39 }
 0x8fb   :  { %3515 = vmatprep.subr.mxu0 %v4336_v0 }
 0x8fc   :  { %3516 = vmatpush3.msra.mxu0 %v4530_v40  ;;  %v1217_v40 = vsub.s32 5, %v4628_v3 }
 0x8fd   :  { %3517 = vmatprep.subr.mxu0 %v4336_v0 }
 0x8fe   :  { %3518 = vmatpush3.msra.mxu0 %v4534_v41  ;;  %v1218_v41 = vrot.slane %v4889_v23, %v1217_v40  ;;  %v5295_v40 = vld [vmem:[#allocation11 + $0x28] sm:$0xff] }
 0x8ff   :  { %3519 = vmatprep.subr.mxu0 %v4336_v0 }
 0x900   :  { %3520 = vmatpush3.msra.mxu0 %v4538_v42 }
 0x901   :  { %3521 = vmatprep.subr.mxu0 %v4336_v0 }
 0x902   :  { %3522 = vmatpush3.msra.mxu0 %v4542_v43 }
 0x903   :  { %3523 = vmatprep.subr.mxu0 %v4336_v0 }
 0x904   :  { %3524 = vmatpush3.msra.mxu0 %v4546_v44 }
 0x905   :  { %3525 = vmatprep.subr.mxu0 %v4336_v0 }
 0x906   :  { %3526 = vmatpush3.msra.mxu0 %v4550_v45 }
 0x907   :  { %3527 = vmatprep.subr.mxu0 %v4336_v0 }
 0x908   :  { %3528 = vmatpush3.msra.mxu0 %v4554_v46 }
 0x909   :  { %3529 = vmatprep.subr.mxu0 %v4336_v0 }
 0x90a   :  { %3530 = vmatpush3.msra.mxu0 %v4560_v47 }
 0x90b   :  { %3531 = vmatprep.subr.mxu0 %v4336_v0 }
 0x90c   :  { %3532 = vmatpush3.msra.mxu0 %v4564_v48 }
 0x90d   :  { %3533 = vmatprep.subr.mxu0 %v4336_v0 }
 0x90e   :  { %3534 = vmatpush3.msra.mxu0 %v4568_v49 }
 0x90f   :  { %3535 = vmatprep.subr.mxu0 %v4336_v0 }
 0x910   :  { %3536 = vmatpush3.msra.mxu0 %v4572_v50 }
 0x911   :  { %3575 = vmatprep.subr.mxu0 %v4336_v0 }
 0x9b1   :  { %v1138_v35 = vpop.f32.mrf.mxu0 }
 0x9b2   :  { %v1139_v36 = vadd.f32 %v4731_v15, %v1138_v35  ;;  %v5275_v35 = vld [vmem:[#allocation11 + $0x50] sm:$0xff] }
 0x9b3   :  { %v3469_v37 = vpop.f32.mrf.mxu0 }
 0x9b4   :  { %v1142_v38 = vmul.f32 0.1, %v1139_v36  ;;  %v5279_v36 = vld [vmem:[#allocation11 + $0x48] sm:$0xff]  ;;  %v5283_v37 = vld [vmem:[#allocation11 + $0x40] sm:$0xff] }
 0x9b6   :  { %v5107_v39 = vsub.f32 %v4964_v18, %v1142_v38  ;;  %v5287_v38 = vld [vmem:[#allocation11 + $0x38] sm:$0xff] }
 0x9b8   :  { %3503 = vmatmul.mubr.f32.vlgmr.msra.gmra.mxu1 %v5107_v39 }
 0x9b9   :  { %3541 = vmatpush3.msra.mxu1 %v4575_v51  ;;  %3572 = vmatprep.mubr.msk.f32.mxu1 %vm4337_vm0, %v4336_v0  ;;  %v5182_v51 = vld [vmem:[#allocation10 + $0x78] sm:$0xff] }
 0x9ba   :  { %3542 = vmatprep.subr.mxu1 %v4336_v0 }
 0x9bb   :  { %3543 = vmatpush3.msra.mxu1 %v4577_v52  ;;  %v5188_v52 = vld [vmem:[#allocation10 + $0x70] sm:$0xff] }
 0x9bc   :  { %3544 = vmatprep.subr.mxu1 %v4336_v0 }
 0x9bd   :  { %3545 = vmatpush3.msra.mxu1 %v4582_v53  ;;  %v5192_v53 = vld [vmem:[#allocation10 + $0x68] sm:$0xff] }
 0x9be   :  { %3546 = vmatprep.subr.mxu1 %v4336_v0 }
 0x9bf   :  { %3547 = vmatpush3.msra.mxu1 %v4586_v54  ;;  %v5196_v54 = vld [vmem:[#allocation10 + $0x60] sm:$0xff] }
 0x9c0   :  { %3548 = vmatprep.subr.mxu1 %v4336_v0 }
 0x9c1   :  { %3549 = vmatpush3.msra.mxu1 %v4590_v55  ;;  %v5200_v55 = vld [vmem:[#allocation10 + $0x58] sm:$0xff] }
 0x9c2   :  { %3550 = vmatprep.subr.mxu1 %v4336_v0 }
 0x9c3   :  { %3551 = vmatpush3.msra.mxu1 %v4594_v56  ;;  %v5204_v56 = vld [vmem:[#allocation10 + $0x50] sm:$0xff] }
 0x9c4   :  { %3552 = vmatprep.subr.mxu1 %v4336_v0 }
 0x9c5   :  { %3553 = vmatpush3.msra.mxu1 %v4598_v57  ;;  %v5208_v57 = vld [vmem:[#allocation10 + $0x48] sm:$0xff] }
 0x9c6   :  { %3554 = vmatprep.subr.mxu1 %v4336_v0 }
 0x9c7   :  { %3555 = vmatpush3.msra.mxu1 %v4602_v58  ;;  %v5212_v58 = vld [vmem:[#allocation10 + $0x40] sm:$0xff] }
 0x9c8   :  { %3556 = vmatprep.subr.mxu1 %v4336_v0 }
 0x9c9   :  { %3557 = vmatpush3.msra.mxu1 %v4606_v59  ;;  %v5216_v59 = vld [vmem:[#allocation10 + $0x38] sm:$0xff] }
 0x9ca   :  { %3558 = vmatprep.subr.mxu1 %v4336_v0 }
 0x9cb   :  { %3559 = vmatpush3.msra.mxu1 %v4610_v60  ;;  %v5220_v60 = vld [vmem:[#allocation10 + $0x30] sm:$0xff] }
 0x9cc   :  { %3560 = vmatprep.subr.mxu1 %v4336_v0 }
 0x9cd   :  { %3561 = vmatpush3.msra.mxu1 %v4614_v61  ;;  %v5224_v61 = vld [vmem:[#allocation10 + $0x28] sm:$0xff] }
 0x9ce   :  { %3562 = vmatprep.subr.mxu1 %v4336_v0 }
 0x9cf   :  { %3563 = vmatpush3.msra.mxu1 %v4618_v62  ;;  %v5228_v62 = vld [vmem:[#allocation10 + $0x20] sm:$0xff] }
 0x9d0   :  { %3564 = vmatprep.subr.mxu1 %v4336_v0 }
 0x9d1   :  { %3565 = vmatpush3.msra.mxu1 %v4622_v63  ;;  %v5232_v63 = vld [vmem:[#allocation10 + $0x18] sm:$0xff] }
 0x9d2   :  { %3566 = vmatprep.subr.mxu1 %v4336_v0 }
 0x9d3   :  { %3567 = vmatpush3.msra.mxu1 %v4676_v25  ;;  %v5236_v25 = vld [vmem:[#allocation10 + $0x10] sm:$0xff] }
 0x9d4   :  { %3568 = vmatprep.subr.mxu1 %v4336_v0 }
 0x9d5   :  { %3569 = vmatpush3.msra.mxu1 %v4680_v27  ;;  %v5240_v27 = vld [vmem:[#allocation10 + $0x8] sm:$0xff] }
 0x9d6   :  { %3570 = vmatprep.subr.mxu1 %v4336_v0 }
 0x9d7   :  { %3571 = vmatpush3.msra.mxu1 %v4684_v29  ;;  %v5244_v29 = vld [vmem:[#allocation10] sm:$0xff] }
 0x9d8   :  { %3610 = vmatprep.subr.mxu1 %v4336_v0 }
 0xa78   :  { %v1210_v42 = vpop.f32.mrf.mxu1 }
 0xa79   :  { %v1214_v43 = vadd.f32 %v1210_v42, %v4639_v11  ;;  %v5303_v42 = vld [vmem:[#allocation11 + $0x18] sm:$0xff] }
 0xa7a   :  { %v3504_v44 = vpop.f32.mrf.mxu1 }
 0xa7b   :  { %v1219_v45 = vadd.f32 %v1218_v41, %v1214_v43  ;;  %v5299_v41 = vld [vmem:[#allocation11 + $0x20] sm:$0xff]  ;;  %v5307_v43 = vld [vmem:[#allocation11 + $0x10] sm:$0xff]  ;;  %v5311_v44 = vld [vmem:[#allocation11 + $0x8] sm:$0xff] }
 0xa7d   :  { %v1220_v46 = vmax.f32 %v1219_v45, 0.0  ;;  %v5315_v45 = vld [vmem:[#allocation11] sm:$0xff] }
 0xa7f   :  { %3538 = vmatmul.mubr.f32.vlgmr.msra.gmra.mxu0 %v1220_v46  ;;  %v1437_v46 = vsub.s32 4, %v4628_v3 }
 0xa80   :  { %3576 = vmatpush3.msra.mxu0 %v5004_v7  ;;  %3607 = vmatprep.mubr.msk.f32.mxu0 %vm4337_vm0, %v4336_v0 }
 0xa81   :  { %3577 = vmatprep.subr.mxu0 %v4336_v0 }
 0xa82   :  { %3578 = vmatpush3.msra.mxu0 %v5010_v33 }
 0xa83   :  { %3579 = vmatprep.subr.mxu0 %v4336_v0 }
 0xa84   :  { %3580 = vmatpush3.msra.mxu0 %v5014_v1 }
 0xa85   :  { %3581 = vmatprep.subr.mxu0 %v4336_v0 }
 0xa86   :  { %3582 = vmatpush3.msra.mxu0 %v5018_v9 }
 0xa87   :  { %3583 = vmatprep.subr.mxu0 %v4336_v0 }
 0xa88   :  { %3584 = vmatpush3.msra.mxu0 %v5022_v13 }
 0xa89   :  { %3585 = vmatprep.subr.mxu0 %v4336_v0 }
 0xa8a   :  { %3586 = vmatpush3.msra.mxu0 %v5026_v17 }
 0xa8b   :  { %3587 = vmatprep.subr.mxu0 %v4336_v0 }
 0xa8c   :  { %3588 = vmatpush3.msra.mxu0 %v5030_v19 }
 0xa8d   :  { %3589 = vmatprep.subr.mxu0 %v4336_v0 }
 0xa8e   :  { %3590 = vmatpush3.msra.mxu0 %v5034_v21 }
 0xa8f   :  { %3591 = vmatprep.subr.mxu0 %v4336_v0 }
 0xa90   :  { %3592 = vmatpush3.msra.mxu0 %v5038_v2 }
 0xa91   :  { %3593 = vmatprep.subr.mxu0 %v4336_v0 }
 0xa92   :  { %3594 = vmatpush3.msra.mxu0 %v5042_v4 }
 0xa93   :  { %3595 = vmatprep.subr.mxu0 %v4336_v0 }
 0xa94   :  { %3596 = vmatpush3.msra.mxu0 %v5046_v6 }
 0xa95   :  { %3597 = vmatprep.subr.mxu0 %v4336_v0 }
 0xa96   :  { %3598 = vmatpush3.msra.mxu0 %v5050_v8 }
 0xa97   :  { %3599 = vmatprep.subr.mxu0 %v4336_v0 }
 0xa98   :  { %3600 = vmatpush3.msra.mxu0 %v5054_v10 }
 0xa99   :  { %3601 = vmatprep.subr.mxu0 %v4336_v0 }
 0xa9a   :  { %3602 = vmatpush3.msra.mxu0 %v5058_v12 }
 0xa9b   :  { %3603 = vmatprep.subr.mxu0 %v4336_v0 }
 0xa9c   :  { %3604 = vmatpush3.msra.mxu0 %v5062_v14 }
 0xa9d   :  { %3605 = vmatprep.subr.mxu0 %v4336_v0 }
 0xa9e   :  { %3606 = vmatpush3.msra.mxu0 %v5066_v16 }
 0xa9f   :  { %3645 = vmatprep.subr.mxu0 %v4336_v0 }
 0xb3f   :  { %v1287_v47 = vpop.f32.mrf.mxu0 }
 0xb40   :  { %v1288_v48 = vadd.f32 %v4691_v31, %v1287_v47  ;;  %v1438_v47 = vrot.slane %v4889_v23, %v1437_v46 }
 0xb41   :  { %v3539_v49 = vpop.f32.mrf.mxu0 }
 0xb42   :  { %v1291_v50 = vmax.f32 %v1288_v48, 0.0 }
 0xb44   :  { %3573 = vmatmul.mubr.f32.vlgmr.msra.gmra.mxu1 %v1291_v50 }
 0xb45   :  { %3611 = vmatpush3.msra.mxu1 %v5182_v51  ;;  %3642 = vmatprep.mubr.msk.f32.mxu1 %vm4337_vm0, %v4336_v0 }
 0xb46   :  { %3612 = vmatprep.subr.mxu1 %v4336_v0 }
 0xb47   :  { %3613 = vmatpush3.msra.mxu1 %v5188_v52 }
 0xb48   :  { %3614 = vmatprep.subr.mxu1 %v4336_v0 }
 0xb49   :  { %3615 = vmatpush3.msra.mxu1 %v5192_v53 }
 0xb4a   :  { %3616 = vmatprep.subr.mxu1 %v4336_v0 }
 0xb4b   :  { %3617 = vmatpush3.msra.mxu1 %v5196_v54 }
 0xb4c   :  { %3618 = vmatprep.subr.mxu1 %v4336_v0 }
 0xb4d   :  { %3619 = vmatpush3.msra.mxu1 %v5200_v55 }
 0xb4e   :  { %3620 = vmatprep.subr.mxu1 %v4336_v0 }
 0xb4f   :  { %3621 = vmatpush3.msra.mxu1 %v5204_v56 }
 0xb50   :  { %3622 = vmatprep.subr.mxu1 %v4336_v0 }
 0xb51   :  { %3623 = vmatpush3.msra.mxu1 %v5208_v57 }
 0xb52   :  { %3624 = vmatprep.subr.mxu1 %v4336_v0 }
 0xb53   :  { %3625 = vmatpush3.msra.mxu1 %v5212_v58 }
 0xb54   :  { %3626 = vmatprep.subr.mxu1 %v4336_v0 }
 0xb55   :  { %3627 = vmatpush3.msra.mxu1 %v5216_v59 }
 0xb56   :  { %3628 = vmatprep.subr.mxu1 %v4336_v0 }
 0xb57   :  { %3629 = vmatpush3.msra.mxu1 %v5220_v60 }
 0xb58   :  { %3630 = vmatprep.subr.mxu1 %v4336_v0 }
 0xb59   :  { %3631 = vmatpush3.msra.mxu1 %v5224_v61 }
 0xb5a   :  { %3632 = vmatprep.subr.mxu1 %v4336_v0 }
 0xb5b   :  { %3633 = vmatpush3.msra.mxu1 %v5228_v62 }
 0xb5c   :  { %3634 = vmatprep.subr.mxu1 %v4336_v0 }
 0xb5d   :  { %3635 = vmatpush3.msra.mxu1 %v5232_v63 }
 0xb5e   :  { %3636 = vmatprep.subr.mxu1 %v4336_v0 }
 0xb5f   :  { %3637 = vmatpush3.msra.mxu1 %v5236_v25 }
 0xb60   :  { %3638 = vmatprep.subr.mxu1 %v4336_v0 }
 0xb61   :  { %3639 = vmatpush3.msra.mxu1 %v5240_v27 }
 0xb62   :  { %3640 = vmatprep.subr.mxu1 %v4336_v0 }
 0xb63   :  { %3641 = vmatpush3.msra.mxu1 %v5244_v29 }
 0xb64   :  { %3680 = vmatprep.subr.mxu1 %v4336_v0 }
 0xc04   :  { %v1358_v31 = vpop.f32.mrf.mxu1 }
 0xc05   :  { %v1359_v18 = vadd.f32 %v4731_v15, %v1358_v31  ;;  %v5263_v15 = vld [vmem:[#allocation11 + $0x68] sm:$0xff] }
 0xc06   :  { %v3574_v28 = vpop.f32.mrf.mxu1 }
 0xc07   :  { %v1362_v30 = vmul.f32 0.1, %v1359_v18 }
 0xc09   :  { %v5250_v32 = vsub.f32 %v5107_v39, %v1362_v30  ;;  %v5291_v39 = vld [vmem:[#allocation11 + $0x30] sm:$0xff] }
 0xc0a   :  { %v5359_v30 = vld [vmem:[%s5773_s6] ss:$0 sm:$0xff] }
 0xc0b   :  { %3608 = vmatmul.mubr.f32.vlgmr.msra.gmra.mxu0 %v5250_v32 }
 0xc0c   :  { %3646 = vmatpush3.msra.mxu0 %v5253_v20  ;;  %3677 = vmatprep.mubr.msk.f32.mxu0 %vm4337_vm0, %v4336_v0 }
 0xc0d   :  { %3647 = vmatprep.subr.mxu0 %v4336_v0 }
 0xc0e   :  { %3648 = vmatpush3.msra.mxu0 %v5259_v22 }
 0xc0f   :  { %3649 = vmatprep.subr.mxu0 %v4336_v0 }
 0xc10   :  { %3650 = vmatpush3.msra.mxu0 %v5263_v15 }
 0xc11   :  { %3651 = vmatprep.subr.mxu0 %v4336_v0 }
 0xc12   :  { %3652 = vmatpush3.msra.mxu0 %v5267_v24 }
 0xc13   :  { %3653 = vmatprep.subr.mxu0 %v4336_v0 }
 0xc14   :  { %3654 = vmatpush3.msra.mxu0 %v5271_v26 }
 0xc15   :  { %3655 = vmatprep.subr.mxu0 %v4336_v0 }
 0xc16   :  { %3656 = vmatpush3.msra.mxu0 %v5275_v35 }
 0xc17   :  { %3657 = vmatprep.subr.mxu0 %v4336_v0 }
 0xc18   :  { %3658 = vmatpush3.msra.mxu0 %v5279_v36 }
 0xc19   :  { %3659 = vmatprep.subr.mxu0 %v4336_v0 }
 0xc1a   :  { %3660 = vmatpush3.msra.mxu0 %v5283_v37 }
 0xc1b   :  { %3661 = vmatprep.subr.mxu0 %v4336_v0 }
 0xc1c   :  { %3662 = vmatpush3.msra.mxu0 %v5287_v38 }
 0xc1d   :  { %3663 = vmatprep.subr.mxu0 %v4336_v0 }
 0xc1e   :  { %3664 = vmatpush3.msra.mxu0 %v5291_v39 }
 0xc1f   :  { %3665 = vmatprep.subr.mxu0 %v4336_v0 }
 0xc20   :  { %3666 = vmatpush3.msra.mxu0 %v5295_v40 }
 0xc21   :  { %3667 = vmatprep.subr.mxu0 %v4336_v0 }
 0xc22   :  { %3668 = vmatpush3.msra.mxu0 %v5299_v41 }
 0xc23   :  { %3669 = vmatprep.subr.mxu0 %v4336_v0 }
 0xc24   :  { %3670 = vmatpush3.msra.mxu0 %v5303_v42 }
 0xc25   :  { %3671 = vmatprep.subr.mxu0 %v4336_v0 }
 0xc26   :  { %3672 = vmatpush3.msra.mxu0 %v5307_v43 }
 0xc27   :  { %3673 = vmatprep.subr.mxu0 %v4336_v0 }
 0xc28   :  { %3674 = vmatpush3.msra.mxu0 %v5311_v44 }
 0xc29   :  { %3675 = vmatprep.subr.mxu0 %v4336_v0 }
 0xc2a   :  { %3676 = vmatpush3.msra.mxu0 %v5315_v45 }
 0xc2b   :  { %3715 = vmatprep.subr.mxu0 %v4336_v0 }
 0xccb   :  { %v1430_v48 = vpop.f32.mrf.mxu0 }
 0xccc   :  { %v1434_v49 = vadd.f32 %v1430_v48, %v4639_v11 }
 0xccd   :  { %v3609_v50 = vpop.f32.mrf.mxu0 }
 0xcce   :  { %v1439_v31 = vadd.f32 %v1438_v47, %v1434_v49  ;;  %v5399_v50 = vld [vmem:[%s5775_s8] ss:$0 sm:$0xff] }
 0xcd0   :  { %v1440_v18 = vmax.f32 %v1439_v31, 0.0 }
 0xcd2   :  { %3643 = vmatmul.mubr.f32.vlgmr.msra.gmra.mxu1 %v1440_v18 }
 0xcd3   :  { %3681 = vmatpush3.msra.mxu1 %v5004_v7  ;;  %3712 = vmatprep.mubr.msk.f32.mxu1 %vm4337_vm0, %v4336_v0 }
 0xcd4   :  { %3682 = vmatprep.subr.mxu1 %v4336_v0 }
 0xcd5   :  { %3683 = vmatpush3.msra.mxu1 %v5010_v33 }
 0xcd6   :  { %3684 = vmatprep.subr.mxu1 %v4336_v0 }
 0xcd7   :  { %3685 = vmatpush3.msra.mxu1 %v5014_v1 }
 0xcd8   :  { %3686 = vmatprep.subr.mxu1 %v4336_v0 }
 0xcd9   :  { %3687 = vmatpush3.msra.mxu1 %v5018_v9 }
 0xcda   :  { %3688 = vmatprep.subr.mxu1 %v4336_v0 }
 0xcdb   :  { %3689 = vmatpush3.msra.mxu1 %v5022_v13 }
 0xcdc   :  { %3690 = vmatprep.subr.mxu1 %v4336_v0 }
 0xcdd   :  { %3691 = vmatpush3.msra.mxu1 %v5026_v17 }
 0xcde   :  { %3692 = vmatprep.subr.mxu1 %v4336_v0 }
 0xcdf   :  { %3693 = vmatpush3.msra.mxu1 %v5030_v19 }
 0xce0   :  { %3694 = vmatprep.subr.mxu1 %v4336_v0 }
 0xce1   :  { %3695 = vmatpush3.msra.mxu1 %v5034_v21 }
 0xce2   :  { %3696 = vmatprep.subr.mxu1 %v4336_v0 }
 0xce3   :  { %3697 = vmatpush3.msra.mxu1 %v5038_v2 }
 0xce4   :  { %3698 = vmatprep.subr.mxu1 %v4336_v0 }
 0xce5   :  { %3699 = vmatpush3.msra.mxu1 %v5042_v4 }
 0xce6   :  { %3700 = vmatprep.subr.mxu1 %v4336_v0 }
 0xce7   :  { %3701 = vmatpush3.msra.mxu1 %v5046_v6 }
 0xce8   :  { %3702 = vmatprep.subr.mxu1 %v4336_v0 }
 0xce9   :  { %3703 = vmatpush3.msra.mxu1 %v5050_v8 }
 0xcea   :  { %3704 = vmatprep.subr.mxu1 %v4336_v0 }
 0xceb   :  { %3705 = vmatpush3.msra.mxu1 %v5054_v10 }
 0xcec   :  { %3706 = vmatprep.subr.mxu1 %v4336_v0 }
 0xced   :  { %3707 = vmatpush3.msra.mxu1 %v5058_v12 }
 0xcee   :  { %3708 = vmatprep.subr.mxu1 %v4336_v0 }
 0xcef   :  { %3709 = vmatpush3.msra.mxu1 %v5062_v14 }
 0xcf0   :  { %3710 = vmatprep.subr.mxu1 %v4336_v0 }
 0xcf1   :  { %3711 = vmatpush3.msra.mxu1 %v5066_v16 }
 0xcf2   :  { %3750 = vmatprep.subr.mxu1 %v4336_v0 }
 0xd92   :  { %v1507_v28 = vpop.f32.mrf.mxu1 }
 0xd93   :  { %v1508_v46 = vadd.f32 %v5359_v30, %v1507_v28 }
 0xd94   :  { %v3644_v47 = vpop.f32.mrf.mxu1 }
 0xd95   :  { %v1511_v48 = vmax.f32 %v1508_v46, 0.0 }
 0xd97   :  { %3678 = vmatmul.mubr.f32.vlgmr.msra.gmra.mxu0 %v1511_v48 }
 0xd98   :  { %3716 = vmatpush3.msra.mxu0 %v5182_v51  ;;  %3747 = vmatprep.mubr.msk.f32.mxu0 %vm4337_vm0, %v4336_v0 }
 0xd99   :  { %3717 = vmatprep.subr.mxu0 %v4336_v0 }
 0xd9a   :  { %3718 = vmatpush3.msra.mxu0 %v5188_v52 }
 0xd9b   :  { %3719 = vmatprep.subr.mxu0 %v4336_v0 }
 0xd9c   :  { %3720 = vmatpush3.msra.mxu0 %v5192_v53 }
 0xd9d   :  { %3721 = vmatprep.subr.mxu0 %v4336_v0 }
 0xd9e   :  { %3722 = vmatpush3.msra.mxu0 %v5196_v54 }
 0xd9f   :  { %3723 = vmatprep.subr.mxu0 %v4336_v0 }
 0xda0   :  { %3724 = vmatpush3.msra.mxu0 %v5200_v55 }
 0xda1   :  { %3725 = vmatprep.subr.mxu0 %v4336_v0 }
 0xda2   :  { %3726 = vmatpush3.msra.mxu0 %v5204_v56 }
 0xda3   :  { %3727 = vmatprep.subr.mxu0 %v4336_v0 }
 0xda4   :  { %3728 = vmatpush3.msra.mxu0 %v5208_v57 }
 0xda5   :  { %3729 = vmatprep.subr.mxu0 %v4336_v0 }
 0xda6   :  { %3730 = vmatpush3.msra.mxu0 %v5212_v58 }
 0xda7   :  { %3731 = vmatprep.subr.mxu0 %v4336_v0 }
 0xda8   :  { %3732 = vmatpush3.msra.mxu0 %v5216_v59 }
 0xda9   :  { %3733 = vmatprep.subr.mxu0 %v4336_v0 }
 0xdaa   :  { %3734 = vmatpush3.msra.mxu0 %v5220_v60 }
 0xdab   :  { %3735 = vmatprep.subr.mxu0 %v4336_v0 }
 0xdac   :  { %3736 = vmatpush3.msra.mxu0 %v5224_v61 }
 0xdad   :  { %3737 = vmatprep.subr.mxu0 %v4336_v0 }
 0xdae   :  { %3738 = vmatpush3.msra.mxu0 %v5228_v62 }
 0xdaf   :  { %3739 = vmatprep.subr.mxu0 %v4336_v0 }
 0xdb0   :  { %3740 = vmatpush3.msra.mxu0 %v5232_v63 }
 0xdb1   :  { %3741 = vmatprep.subr.mxu0 %v4336_v0 }
 0xdb2   :  { %3742 = vmatpush3.msra.mxu0 %v5236_v25 }
 0xdb3   :  { %3743 = vmatprep.subr.mxu0 %v4336_v0 }
 0xdb4   :  { %3744 = vmatpush3.msra.mxu0 %v5240_v27 }
 0xdb5   :  { %3745 = vmatprep.subr.mxu0 %v4336_v0 }
 0xdb6   :  { %3746 = vmatpush3.msra.mxu0 %v5244_v29 }
 0xdb7   :  { %3785 = vmatprep.subr.mxu0 %v4336_v0 }
 0xe57   :  { %v1578_v49 = vpop.f32.mrf.mxu0 }
 0xe58   :  { %v1579_v31 = vadd.f32 %v5399_v50, %v1578_v49 }
 0xe59   :  { %v3679_v18 = vpop.f32.mrf.mxu0 }
 0xe5a   :  { %v1582_v28 = vmul.f32 0.1, %v1579_v31 }
 0xe5c   :  { %v5403_v46 = vsub.f32 %v5250_v32, %v1582_v28  ;;  %v1657_v32 = vsub.s32 3, %v4628_v3 }
 0xe5e   :  { %3713 = vmatmul.mubr.f32.vlgmr.msra.gmra.mxu1 %v5403_v46  ;;  %v1658_v47 = vrot.slane %v4889_v23, %v1657_v32 }
 0xe5f   :  { %3751 = vmatpush3.msra.mxu1 %v5253_v20  ;;  %3782 = vmatprep.mubr.msk.f32.mxu1 %vm4337_vm0, %v4336_v0 }
 0xe60   :  { %3752 = vmatprep.subr.mxu1 %v4336_v0 }
 0xe61   :  { %3753 = vmatpush3.msra.mxu1 %v5259_v22 }
 0xe62   :  { %3754 = vmatprep.subr.mxu1 %v4336_v0 }
 0xe63   :  { %3755 = vmatpush3.msra.mxu1 %v5263_v15 }
 0xe64   :  { %3756 = vmatprep.subr.mxu1 %v4336_v0 }
 0xe65   :  { %3757 = vmatpush3.msra.mxu1 %v5267_v24 }
 0xe66   :  { %3758 = vmatprep.subr.mxu1 %v4336_v0 }
 0xe67   :  { %3759 = vmatpush3.msra.mxu1 %v5271_v26 }
 0xe68   :  { %3760 = vmatprep.subr.mxu1 %v4336_v0 }
 0xe69   :  { %3761 = vmatpush3.msra.mxu1 %v5275_v35 }
 0xe6a   :  { %3762 = vmatprep.subr.mxu1 %v4336_v0 }
 0xe6b   :  { %3763 = vmatpush3.msra.mxu1 %v5279_v36 }
 0xe6c   :  { %3764 = vmatprep.subr.mxu1 %v4336_v0 }
 0xe6d   :  { %3765 = vmatpush3.msra.mxu1 %v5283_v37 }
 0xe6e   :  { %3766 = vmatprep.subr.mxu1 %v4336_v0 }
 0xe6f   :  { %3767 = vmatpush3.msra.mxu1 %v5287_v38 }
 0xe70   :  { %3768 = vmatprep.subr.mxu1 %v4336_v0 }
 0xe71   :  { %3769 = vmatpush3.msra.mxu1 %v5291_v39 }
 0xe72   :  { %3770 = vmatprep.subr.mxu1 %v4336_v0 }
 0xe73   :  { %3771 = vmatpush3.msra.mxu1 %v5295_v40 }
 0xe74   :  { %3772 = vmatprep.subr.mxu1 %v4336_v0 }
 0xe75   :  { %3773 = vmatpush3.msra.mxu1 %v5299_v41 }
 0xe76   :  { %3774 = vmatprep.subr.mxu1 %v4336_v0 }
 0xe77   :  { %3775 = vmatpush3.msra.mxu1 %v5303_v42 }
 0xe78   :  { %3776 = vmatprep.subr.mxu1 %v4336_v0 }
 0xe79   :  { %3777 = vmatpush3.msra.mxu1 %v5307_v43 }
 0xe7a   :  { %3778 = vmatprep.subr.mxu1 %v4336_v0 }
 0xe7b   :  { %3779 = vmatpush3.msra.mxu1 %v5311_v44 }
 0xe7c   :  { %3780 = vmatprep.subr.mxu1 %v4336_v0 }
 0xe7d   :  { %3781 = vmatpush3.msra.mxu1 %v5315_v45 }
 0xe7e   :  { %3820 = vmatprep.subr.mxu1 %v4336_v0 }
 0xf1e   :  { %v1650_v48 = vpop.f32.mrf.mxu1 }
 0xf1f   :  { %v1654_v49 = vadd.f32 %v1650_v48, %v4639_v11 }
 0xf20   :  { %v3714_v31 = vpop.f32.mrf.mxu1 }
 0xf21   :  { %v1659_v18 = vadd.f32 %v1658_v47, %v1654_v49 }
 0xf23   :  { %v1660_v28 = vmax.f32 %v1659_v18, 0.0 }
 0xf25   :  { %3748 = vmatmul.mubr.f32.vlgmr.msra.gmra.mxu0 %v1660_v28 }
 0xf26   :  { %3786 = vmatpush3.msra.mxu0 %v5004_v7  ;;  %3817 = vmatprep.mubr.msk.f32.mxu0 %vm4337_vm0, %v4336_v0 }
 0xf27   :  { %3787 = vmatprep.subr.mxu0 %v4336_v0 }
 0xf28   :  { %3788 = vmatpush3.msra.mxu0 %v5010_v33 }
 0xf29   :  { %3789 = vmatprep.subr.mxu0 %v4336_v0 }
 0xf2a   :  { %3790 = vmatpush3.msra.mxu0 %v5014_v1 }
 0xf2b   :  { %3791 = vmatprep.subr.mxu0 %v4336_v0 }
 0xf2c   :  { %3792 = vmatpush3.msra.mxu0 %v5018_v9 }
 0xf2d   :  { %3793 = vmatprep.subr.mxu0 %v4336_v0 }
 0xf2e   :  { %3794 = vmatpush3.msra.mxu0 %v5022_v13 }
 0xf2f   :  { %3795 = vmatprep.subr.mxu0 %v4336_v0 }
 0xf30   :  { %3796 = vmatpush3.msra.mxu0 %v5026_v17 }
 0xf31   :  { %3797 = vmatprep.subr.mxu0 %v4336_v0 }
 0xf32   :  { %3798 = vmatpush3.msra.mxu0 %v5030_v19 }
 0xf33   :  { %3799 = vmatprep.subr.mxu0 %v4336_v0 }
 0xf34   :  { %3800 = vmatpush3.msra.mxu0 %v5034_v21 }
 0xf35   :  { %3801 = vmatprep.subr.mxu0 %v4336_v0 }
 0xf36   :  { %3802 = vmatpush3.msra.mxu0 %v5038_v2 }
 0xf37   :  { %3803 = vmatprep.subr.mxu0 %v4336_v0 }
 0xf38   :  { %3804 = vmatpush3.msra.mxu0 %v5042_v4 }
 0xf39   :  { %3805 = vmatprep.subr.mxu0 %v4336_v0 }
 0xf3a   :  { %3806 = vmatpush3.msra.mxu0 %v5046_v6 }
 0xf3b   :  { %3807 = vmatprep.subr.mxu0 %v4336_v0 }
 0xf3c   :  { %3808 = vmatpush3.msra.mxu0 %v5050_v8 }
 0xf3d   :  { %3809 = vmatprep.subr.mxu0 %v4336_v0 }
 0xf3e   :  { %3810 = vmatpush3.msra.mxu0 %v5054_v10 }
 0xf3f   :  { %3811 = vmatprep.subr.mxu0 %v4336_v0 }
 0xf40   :  { %3812 = vmatpush3.msra.mxu0 %v5058_v12 }
 0xf41   :  { %3813 = vmatprep.subr.mxu0 %v4336_v0 }
 0xf42   :  { %3814 = vmatpush3.msra.mxu0 %v5062_v14 }
 0xf43   :  { %3815 = vmatprep.subr.mxu0 %v4336_v0 }
 0xf44   :  { %3816 = vmatpush3.msra.mxu0 %v5066_v16 }
 0xf45   :  { %3855 = vmatprep.subr.mxu0 %v4336_v0 }
 0xfe5   :  { %v1727_v23 = vpop.f32.mrf.mxu0 }
 0xfe6   :  { %v1728_v32 = vadd.f32 %v5359_v30, %v1727_v23 }
 0xfe7   :  { %v3749_v47 = vpop.f32.mrf.mxu0 }
 0xfe8   :  { %v1731_v48 = vmax.f32 %v1728_v32, 0.0  ;;  %v5555_v32 = vld [vmem:[%s5771_s4] sm:$0xff]  ;;  %s4338_s4 = smov [#allocation13]  }
 0xfe9   :  { %s2473_s25 = sshll.u32 %s4338_s4, 4  ;;  %s2474_s25 = int_to_ptr.vmem [resolvable:$true] %s2473_s25 }
 0xfea   :  { %3783 = vmatmul.mubr.f32.vlgmr.msra.gmra.mxu1 %v1731_v48  ;;  %s4298_s26 = scalar_lea.vmem %s2474_s25, 128  ;;  %p4303_p3 = scmp.lt.s32.totalorder %s2474_s25, %s2474_s25 }
 0xfeb   :  { %3821 = vmatpush3.msra.mxu1 %v5182_v51  ;;  %3852 = vmatprep.mubr.msk.f32.mxu1 %vm4337_vm0, %v4336_v0  ;;  %p4299_p2 = scmp.ne.s32.totalorder %s2474_s25, %s4298_s26  ;;  %p4304_p4 = scmp.lt.s32.totalorder %s4298_s26, %s4298_s26 }
 0xfec   :  { %3822 = vmatprep.subr.mxu1 %v4336_v0 }
 0xfed   :  { %3823 = vmatpush3.msra.mxu1 %v5188_v52  ;;  %p4305_p5 = por %p4304_p4, %p4303_p3 }
 0xfee   :  { %3824 = vmatprep.subr.mxu1 %v4336_v0 }
 0xfef   :  { %3825 = vmatpush3.msra.mxu1 %v5192_v53  ;;  %p4306_p6 = pnand %p4305_p5, %p4299_p2 }
 0xff0   :  { %3826 = vmatprep.subr.mxu1 %v4336_v0 }
 0xff1   :  { %3827 = vmatpush3.msra.mxu1 %v5196_v54 }
 0xff2   :  { %3828 = vmatprep.subr.mxu1 %v4336_v0 }
 0xff3   :  { %3829 = vmatpush3.msra.mxu1 %v5200_v55 }
 0xff4   :  { %3830 = vmatprep.subr.mxu1 %v4336_v0 }
 0xff5   :  { %3831 = vmatpush3.msra.mxu1 %v5204_v56 }
 0xff6   :  { %3832 = vmatprep.subr.mxu1 %v4336_v0 }
 0xff7   :  { %3833 = vmatpush3.msra.mxu1 %v5208_v57 }
 0xff8   :  { %3834 = vmatprep.subr.mxu1 %v4336_v0 }
 0xff9   :  { %3835 = vmatpush3.msra.mxu1 %v5212_v58 }
 0xffa   :  { %3836 = vmatprep.subr.mxu1 %v4336_v0 }
 0xffb   :  { %3837 = vmatpush3.msra.mxu1 %v5216_v59 }
 0xffc   :  { %3838 = vmatprep.subr.mxu1 %v4336_v0 }
 0xffd   :  { %3839 = vmatpush3.msra.mxu1 %v5220_v60 }
 0xffe   :  { %3840 = vmatprep.subr.mxu1 %v4336_v0 }
 0xfff   :  { %3841 = vmatpush3.msra.mxu1 %v5224_v61 }
0x1000   :  { %3842 = vmatprep.subr.mxu1 %v4336_v0 }
0x1001   :  { %3843 = vmatpush3.msra.mxu1 %v5228_v62 }
0x1002   :  { %3844 = vmatprep.subr.mxu1 %v4336_v0 }
0x1003   :  { %3845 = vmatpush3.msra.mxu1 %v5232_v63 }
0x1004   :  { %3846 = vmatprep.subr.mxu1 %v4336_v0 }
0x1005   :  { %3847 = vmatpush3.msra.mxu1 %v5236_v25 }
0x1006   :  { %3848 = vmatprep.subr.mxu1 %v4336_v0 }
0x1007   :  { %3849 = vmatpush3.msra.mxu1 %v5240_v27 }
0x1008   :  { %3850 = vmatprep.subr.mxu1 %v4336_v0 }
0x1009   :  { %3851 = vmatpush3.msra.mxu1 %v5244_v29 }
0x100a   :  { %3890 = vmatprep.subr.mxu1 %v4336_v0 }
0x10aa   :  { %v1798_v49 = vpop.f32.mrf.mxu1 }
0x10ab   :  { %v1799_v31 = vadd.f32 %v5399_v50, %v1798_v49 }
0x10ac   :  { %v3784_v18 = vpop.f32.mrf.mxu1 }
0x10ad   :  { %v1802_v28 = vmul.f32 0.1, %v1799_v31 }
0x10af   :  { %v5514_v23 = vsub.f32 %v5403_v46, %v1802_v28  ;;  %v1877_v46 = vsub.s32 2, %v4628_v3 }
0x10b1   :  { %3818 = vmatmul.mubr.f32.vlgmr.msra.gmra.mxu0 %v5514_v23  ;;  %v1878_v47 = vrot.slane %v5555_v32, %v1877_v46  ;;  %v4164_v46 = vld [vmem:[#allocation8 + $0x68] sm:$0xff] }
0x10b2   :  { %3856 = vmatpush3.msra.mxu0 %v5253_v20  ;;  %3887 = vmatprep.mubr.msk.f32.mxu0 %vm4337_vm0, %v4336_v0 }
0x10b3   :  { %3857 = vmatprep.subr.mxu0 %v4336_v0 }
0x10b4   :  { %3858 = vmatpush3.msra.mxu0 %v5259_v22 }
0x10b5   :  { %3859 = vmatprep.subr.mxu0 %v4336_v0 }
0x10b6   :  { %3860 = vmatpush3.msra.mxu0 %v5263_v15 }
0x10b7   :  { %3861 = vmatprep.subr.mxu0 %v4336_v0 }
0x10b8   :  { %3862 = vmatpush3.msra.mxu0 %v5267_v24 }
0x10b9   :  { %3863 = vmatprep.subr.mxu0 %v4336_v0 }
0x10ba   :  { %3864 = vmatpush3.msra.mxu0 %v5271_v26 }
0x10bb   :  { %3865 = vmatprep.subr.mxu0 %v4336_v0 }
0x10bc   :  { %3866 = vmatpush3.msra.mxu0 %v5275_v35 }
0x10bd   :  { %3867 = vmatprep.subr.mxu0 %v4336_v0 }
0x10be   :  { %3868 = vmatpush3.msra.mxu0 %v5279_v36 }
0x10bf   :  { %3869 = vmatprep.subr.mxu0 %v4336_v0 }
0x10c0   :  { %3870 = vmatpush3.msra.mxu0 %v5283_v37 }
0x10c1   :  { %3871 = vmatprep.subr.mxu0 %v4336_v0 }
0x10c2   :  { %3872 = vmatpush3.msra.mxu0 %v5287_v38 }
0x10c3   :  { %3873 = vmatprep.subr.mxu0 %v4336_v0 }
0x10c4   :  { %3874 = vmatpush3.msra.mxu0 %v5291_v39 }
0x10c5   :  { %3875 = vmatprep.subr.mxu0 %v4336_v0 }
0x10c6   :  { %3876 = vmatpush3.msra.mxu0 %v5295_v40 }
0x10c7   :  { %3877 = vmatprep.subr.mxu0 %v4336_v0 }
0x10c8   :  { %3878 = vmatpush3.msra.mxu0 %v5299_v41 }
0x10c9   :  { %3879 = vmatprep.subr.mxu0 %v4336_v0 }
0x10ca   :  { %3880 = vmatpush3.msra.mxu0 %v5303_v42 }
0x10cb   :  { %3881 = vmatprep.subr.mxu0 %v4336_v0 }
0x10cc   :  { %3882 = vmatpush3.msra.mxu0 %v5307_v43 }
0x10cd   :  { %3883 = vmatprep.subr.mxu0 %v4336_v0 }
0x10ce   :  { %3884 = vmatpush3.msra.mxu0 %v5311_v44 }
0x10cf   :  { %3885 = vmatprep.subr.mxu0 %v4336_v0 }
0x10d0   :  { %3886 = vmatpush3.msra.mxu0 %v5315_v45 }
0x10d1   :  { %3925 = vmatprep.subr.mxu0 %v4336_v0 }
0x1171   :  { %v1870_v48 = vpop.f32.mrf.mxu0 }
0x1172   :  { %v1874_v49 = vadd.f32 %v1870_v48, %v4639_v11  ;;  %v4167_v48 = vld [vmem:[#allocation8 + $0x50] sm:$0xff] }
0x1173   :  { %v3819_v31 = vpop.f32.mrf.mxu0 }
0x1174   :  { %v1879_v18 = vadd.f32 %v1878_v47, %v1874_v49  ;;  %v4166_v47 = vld [vmem:[#allocation8 + $0x58] sm:$0xff]  ;;  %v4168_v49 = vld [vmem:[#allocation8 + $0x48] sm:$0xff]  ;;  %v4169_v31 = vld [vmem:[#allocation8 + $0x40] sm:$0xff] }
0x1176   :  { %v1880_v28 = vmax.f32 %v1879_v18, 0.0  ;;  %v4170_v18 = vld [vmem:[#allocation8 + $0x38] sm:$0xff] }
0x1178   :  { %3853 = vmatmul.mubr.f32.vlgmr.msra.gmra.mxu1 %v1880_v28  ;;  %v4171_v28 = vld [vmem:[#allocation8 + $0x30] sm:$0xff] }
0x1179   :  { %3891 = vmatpush3.msra.mxu1 %v5004_v7  ;;  %3922 = vmatprep.mubr.msk.f32.mxu1 %vm4337_vm0, %v4336_v0 }
0x117a   :  { %3892 = vmatprep.subr.mxu1 %v4336_v0 }
0x117b   :  { %3893 = vmatpush3.msra.mxu1 %v5010_v33 }
0x117c   :  { %3894 = vmatprep.subr.mxu1 %v4336_v0 }
0x117d   :  { %3895 = vmatpush3.msra.mxu1 %v5014_v1 }
0x117e   :  { %3896 = vmatprep.subr.mxu1 %v4336_v0 }
0x117f   :  { %3897 = vmatpush3.msra.mxu1 %v5018_v9 }
0x1180   :  { %3898 = vmatprep.subr.mxu1 %v4336_v0 }
0x1181   :  { %3899 = vmatpush3.msra.mxu1 %v5022_v13 }
0x1182   :  { %3900 = vmatprep.subr.mxu1 %v4336_v0 }
0x1183   :  { %3901 = vmatpush3.msra.mxu1 %v5026_v17 }
0x1184   :  { %3902 = vmatprep.subr.mxu1 %v4336_v0 }
0x1185   :  { %3903 = vmatpush3.msra.mxu1 %v5030_v19 }
0x1186   :  { %3904 = vmatprep.subr.mxu1 %v4336_v0 }
0x1187   :  { %3905 = vmatpush3.msra.mxu1 %v5034_v21 }
0x1188   :  { %3906 = vmatprep.subr.mxu1 %v4336_v0 }
0x1189   :  { %3907 = vmatpush3.msra.mxu1 %v5038_v2 }
0x118a   :  { %3908 = vmatprep.subr.mxu1 %v4336_v0 }
0x118b   :  { %3909 = vmatpush3.msra.mxu1 %v5042_v4  ;;  %v2098_v4 = vrot.slane %v5555_v32, %v336_v5  ;;  %v4165_v5 = vld [vmem:[#allocation8 + $0x60] sm:$0xff] }
0x118c   :  { %3910 = vmatprep.subr.mxu1 %v4336_v0 }
0x118d   :  { %3911 = vmatpush3.msra.mxu1 %v5046_v6 }
0x118e   :  { %3912 = vmatprep.subr.mxu1 %v4336_v0 }
0x118f   :  { %3913 = vmatpush3.msra.mxu1 %v5050_v8 }
0x1190   :  { %3914 = vmatprep.subr.mxu1 %v4336_v0 }
0x1191   :  { %3915 = vmatpush3.msra.mxu1 %v5054_v10 }
0x1192   :  { %3916 = vmatprep.subr.mxu1 %v4336_v0 }
0x1193   :  { %3917 = vmatpush3.msra.mxu1 %v5058_v12 }
0x1194   :  { %3918 = vmatprep.subr.mxu1 %v4336_v0 }
0x1195   :  { %3919 = vmatpush3.msra.mxu1 %v5062_v14 }
0x1196   :  { %3920 = vmatprep.subr.mxu1 %v4336_v0 }
0x1197   :  { %3921 = vmatpush3.msra.mxu1 %v5066_v16  ;;  %v4162_v16 = vld [vmem:[#allocation8 + $0x78] sm:$0xff] }
0x1198   :  { %3960 = vmatprep.subr.mxu1 %v4336_v0 }
0x1238   :  { %v1947_v7 = vpop.f32.mrf.mxu1 }
0x1239   :  { %v1948_v33 = vadd.f32 %v5359_v30, %v1947_v7  ;;  %v4172_v7 = vld [vmem:[#allocation8 + $0x28] sm:$0xff] }
0x123a   :  { %v3854_v1 = vpop.f32.mrf.mxu1 }
0x123b   :  { %v1951_v9 = vmax.f32 %v1948_v33, 0.0  ;;  %v4173_v33 = vld [vmem:[#allocation8 + $0x20] sm:$0xff]  ;;  %v4174_v1 = vld [vmem:[#allocation8 + $0x18] sm:$0xff] }
0x123d   :  { %3888 = vmatmul.mubr.f32.vlgmr.msra.gmra.mxu0 %v1951_v9  ;;  %v4175_v9 = vld [vmem:[#allocation8 + $0x10] sm:$0xff] }
0x123e   :  { %3926 = vmatpush3.msra.mxu0 %v5182_v51  ;;  %3957 = vmatprep.mubr.msk.f32.mxu0 %vm4337_vm0, %v4336_v0 }
0x123f   :  { %3927 = vmatprep.subr.mxu0 %v4336_v0 }
0x1240   :  { %3928 = vmatpush3.msra.mxu0 %v5188_v52 }
0x1241   :  { %3929 = vmatprep.subr.mxu0 %v4336_v0 }
0x1242   :  { %3930 = vmatpush3.msra.mxu0 %v5192_v53 }
0x1243   :  { %3931 = vmatprep.subr.mxu0 %v4336_v0 }
0x1244   :  { %3932 = vmatpush3.msra.mxu0 %v5196_v54 }
0x1245   :  { %3933 = vmatprep.subr.mxu0 %v4336_v0 }
0x1246   :  { %3934 = vmatpush3.msra.mxu0 %v5200_v55 }
0x1247   :  { %3935 = vmatprep.subr.mxu0 %v4336_v0 }
0x1248   :  { %3936 = vmatpush3.msra.mxu0 %v5204_v56 }
0x1249   :  { %3937 = vmatprep.subr.mxu0 %v4336_v0 }
0x124a   :  { %3938 = vmatpush3.msra.mxu0 %v5208_v57 }
0x124b   :  { %3939 = vmatprep.subr.mxu0 %v4336_v0 }
0x124c   :  { %3940 = vmatpush3.msra.mxu0 %v5212_v58 }
0x124d   :  { %3941 = vmatprep.subr.mxu0 %v4336_v0 }
0x124e   :  { %3942 = vmatpush3.msra.mxu0 %v5216_v59 }
0x124f   :  { %3943 = vmatprep.subr.mxu0 %v4336_v0 }
0x1250   :  { %3944 = vmatpush3.msra.mxu0 %v5220_v60 }
0x1251   :  { %3945 = vmatprep.subr.mxu0 %v4336_v0 }
0x1252   :  { %3946 = vmatpush3.msra.mxu0 %v5224_v61 }
0x1253   :  { %3947 = vmatprep.subr.mxu0 %v4336_v0 }
0x1254   :  { %3948 = vmatpush3.msra.mxu0 %v5228_v62 }
0x1255   :  { %3949 = vmatprep.subr.mxu0 %v4336_v0 }
0x1256   :  { %3950 = vmatpush3.msra.mxu0 %v5232_v63 }
0x1257   :  { %3951 = vmatprep.subr.mxu0 %v4336_v0 }
0x1258   :  { %3952 = vmatpush3.msra.mxu0 %v5236_v25 }
0x1259   :  { %3953 = vmatprep.subr.mxu0 %v4336_v0 }
0x125a   :  { %3954 = vmatpush3.msra.mxu0 %v5240_v27 }
0x125b   :  { %3955 = vmatprep.subr.mxu0 %v4336_v0 }
0x125c   :  { %3956 = vmatpush3.msra.mxu0 %v5244_v29 }
0x125d   :  { %3995 = vmatprep.subr.mxu0 %v4336_v0 }
0x12fd   :  { %v2018_v13 = vpop.f32.mrf.mxu0 }
0x12fe   :  { %v2019_v17 = vadd.f32 %v5399_v50, %v2018_v13  ;;  %v4176_v13 = vld [vmem:[#allocation8 + $0x8] sm:$0xff] }
0x12ff   :  { %v3889_v19 = vpop.f32.mrf.mxu0 }
0x1300   :  { %v2022_v21 = vmul.f32 0.1, %v2019_v17  ;;  %v4177_v17 = vld [vmem:[#allocation8] sm:$0xff] }
0x1302   :  { %v5630_v2 = vsub.f32 %v5514_v23, %v2022_v21  ;;  %v4163_v23 = vld [vmem:[#allocation8 + $0x70] sm:$0xff] }
0x1304   :  { %3923 = vmatmul.mubr.f32.vlgmr.msra.gmra.mxu1 %v5630_v2 }
0x1305   :  { %3961 = vmatpush3.msra.mxu1 %v5253_v20  ;;  %3992 = vmatprep.mubr.msk.f32.mxu1 %vm4337_vm0, %v4336_v0 }
0x1306   :  { %3962 = vmatprep.subr.mxu1 %v4336_v0 }
0x1307   :  { %3963 = vmatpush3.msra.mxu1 %v5259_v22 }
0x1308   :  { %3964 = vmatprep.subr.mxu1 %v4336_v0 }
0x1309   :  { %3965 = vmatpush3.msra.mxu1 %v5263_v15 }
0x130a   :  { %3966 = vmatprep.subr.mxu1 %v4336_v0 }
0x130b   :  { %3967 = vmatpush3.msra.mxu1 %v5267_v24 }
0x130c   :  { %3968 = vmatprep.subr.mxu1 %v4336_v0 }
0x130d   :  { %3969 = vmatpush3.msra.mxu1 %v5271_v26 }
0x130e   :  { %3970 = vmatprep.subr.mxu1 %v4336_v0 }
0x130f   :  { %3971 = vmatpush3.msra.mxu1 %v5275_v35 }
0x1310   :  { %3972 = vmatprep.subr.mxu1 %v4336_v0 }
0x1311   :  { %3973 = vmatpush3.msra.mxu1 %v5279_v36 }
0x1312   :  { %3974 = vmatprep.subr.mxu1 %v4336_v0 }
0x1313   :  { %3975 = vmatpush3.msra.mxu1 %v5283_v37 }
0x1314   :  { %3976 = vmatprep.subr.mxu1 %v4336_v0 }
0x1315   :  { %3977 = vmatpush3.msra.mxu1 %v5287_v38 }
0x1316   :  { %3978 = vmatprep.subr.mxu1 %v4336_v0 }
0x1317   :  { %3979 = vmatpush3.msra.mxu1 %v5291_v39 }
0x1318   :  { %3980 = vmatprep.subr.mxu1 %v4336_v0 }
0x1319   :  { %3981 = vmatpush3.msra.mxu1 %v5295_v40 }
0x131a   :  { %3982 = vmatprep.subr.mxu1 %v4336_v0 }
0x131b   :  { %3983 = vmatpush3.msra.mxu1 %v5299_v41 }
0x131c   :  { %3984 = vmatprep.subr.mxu1 %v4336_v0 }
0x131d   :  { %3985 = vmatpush3.msra.mxu1 %v5303_v42 }
0x131e   :  { %3986 = vmatprep.subr.mxu1 %v4336_v0 }
0x131f   :  { %3987 = vmatpush3.msra.mxu1 %v5307_v43 }
0x1320   :  { %3988 = vmatprep.subr.mxu1 %v4336_v0 }
0x1321   :  { %3989 = vmatpush3.msra.mxu1 %v5311_v44 }
0x1322   :  { %3990 = vmatprep.subr.mxu1 %v4336_v0 }
0x1323   :  { %3991 = vmatpush3.msra.mxu1 %v5315_v45 }
0x1324   :  { %4030 = vmatprep.subr.mxu1 %v4336_v0 }
0x13c4   :  { %v2090_v6 = vpop.f32.mrf.mxu1 }
0x13c5   :  { %v2094_v8 = vadd.f32 %v2090_v6, %v4639_v11 }
0x13c6   :  { %v3924_v10 = vpop.f32.mrf.mxu1 }
0x13c7   :  { %v2099_v12 = vadd.f32 %v2098_v4, %v2094_v8 }
0x13c9   :  { %v2100_v14 = vmax.f32 %v2099_v12, 0.0 }
0x13cb   :  { %3958 = vmatmul.mubr.f32.vlgmr.msra.gmra.mxu0 %v2100_v14 }
0x13cc   :  { %3996 = vmatpush3.msra.mxu0 %v4162_v16  ;;  %4027 = vmatprep.mubr.msk.f32.mxu0 %vm4337_vm0, %v4336_v0 }
0x13cd   :  { %3997 = vmatprep.subr.mxu0 %v4336_v0 }
0x13ce   :  { %3998 = vmatpush3.msra.mxu0 %v4163_v23 }
0x13cf   :  { %3999 = vmatprep.subr.mxu0 %v4336_v0 }
0x13d0   :  { %4000 = vmatpush3.msra.mxu0 %v4164_v46 }
0x13d1   :  { %4001 = vmatprep.subr.mxu0 %v4336_v0 }
0x13d2   :  { %4002 = vmatpush3.msra.mxu0 %v4165_v5 }
0x13d3   :  { %4003 = vmatprep.subr.mxu0 %v4336_v0 }
0x13d4   :  { %4004 = vmatpush3.msra.mxu0 %v4166_v47 }
0x13d5   :  { %4005 = vmatprep.subr.mxu0 %v4336_v0 }
0x13d6   :  { %4006 = vmatpush3.msra.mxu0 %v4167_v48 }
0x13d7   :  { %4007 = vmatprep.subr.mxu0 %v4336_v0 }
0x13d8   :  { %4008 = vmatpush3.msra.mxu0 %v4168_v49 }
0x13d9   :  { %4009 = vmatprep.subr.mxu0 %v4336_v0 }
0x13da   :  { %4010 = vmatpush3.msra.mxu0 %v4169_v31 }
0x13db   :  { %4011 = vmatprep.subr.mxu0 %v4336_v0 }
0x13dc   :  { %4012 = vmatpush3.msra.mxu0 %v4170_v18 }
0x13dd   :  { %4013 = vmatprep.subr.mxu0 %v4336_v0 }
0x13de   :  { %4014 = vmatpush3.msra.mxu0 %v4171_v28 }
0x13df   :  { %4015 = vmatprep.subr.mxu0 %v4336_v0 }
0x13e0   :  { %4016 = vmatpush3.msra.mxu0 %v4172_v7 }
0x13e1   :  { %4017 = vmatprep.subr.mxu0 %v4336_v0 }
0x13e2   :  { %4018 = vmatpush3.msra.mxu0 %v4173_v33 }
0x13e3   :  { %4019 = vmatprep.subr.mxu0 %v4336_v0 }
0x13e4   :  { %4020 = vmatpush3.msra.mxu0 %v4174_v1 }
0x13e5   :  { %4021 = vmatprep.subr.mxu0 %v4336_v0 }
0x13e6   :  { %4022 = vmatpush3.msra.mxu0 %v4175_v9 }
0x13e7   :  { %4023 = vmatprep.subr.mxu0 %v4336_v0 }
0x13e8   :  { %4024 = vmatpush3.msra.mxu0 %v4176_v13 }
0x13e9   :  { %4025 = vmatprep.subr.mxu0 %v4336_v0 }
0x13ea   :  { %4026 = vmatpush3.msra.mxu0 %v4177_v17 }
0x13eb   :  { %4065 = vmatprep.subr.mxu0 %v4336_v0 }
0x148b   :  { %v2167_v19 = vpop.f32.mrf.mxu0 }
0x148c   :  { %v2168_v21 = vadd.f32 %v5359_v30, %v2167_v19 }
0x148d   :  { %v3959_v4 = vpop.f32.mrf.mxu0 }
0x148e   :  { %v2171_v6 = vmax.f32 %v2168_v21, 0.0 }
0x1490   :  { %3993 = vmatmul.mubr.f32.vlgmr.msra.gmra.mxu1 %v2171_v6 }
0x1491   :  { %4031 = vmatpush3.msra.mxu1 %v5182_v51  ;;  %4062 = vmatprep.mubr.msk.f32.mxu1 %vm4337_vm0, %v4336_v0 }
0x1492   :  { %4032 = vmatprep.subr.mxu1 %v4336_v0 }
0x1493   :  { %4033 = vmatpush3.msra.mxu1 %v5188_v52 }
0x1494   :  { %4034 = vmatprep.subr.mxu1 %v4336_v0 }
0x1495   :  { %4035 = vmatpush3.msra.mxu1 %v5192_v53 }
0x1496   :  { %4036 = vmatprep.subr.mxu1 %v4336_v0 }
0x1497   :  { %4037 = vmatpush3.msra.mxu1 %v5196_v54 }
0x1498   :  { %4038 = vmatprep.subr.mxu1 %v4336_v0 }
0x1499   :  { %4039 = vmatpush3.msra.mxu1 %v5200_v55 }
0x149a   :  { %4040 = vmatprep.subr.mxu1 %v4336_v0 }
0x149b   :  { %4041 = vmatpush3.msra.mxu1 %v5204_v56  ;;  %v2318_v56 = vrot.slane %v5555_v32, %v557_v34 }
0x149c   :  { %4042 = vmatprep.subr.mxu1 %v4336_v0 }
0x149d   :  { %4043 = vmatpush3.msra.mxu1 %v5208_v57 }
0x149e   :  { %4044 = vmatprep.subr.mxu1 %v4336_v0 }
0x149f   :  { %4045 = vmatpush3.msra.mxu1 %v5212_v58 }
0x14a0   :  { %4046 = vmatprep.subr.mxu1 %v4336_v0 }
0x14a1   :  { %4047 = vmatpush3.msra.mxu1 %v5216_v59 }
0x14a2   :  { %4048 = vmatprep.subr.mxu1 %v4336_v0 }
0x14a3   :  { %4049 = vmatpush3.msra.mxu1 %v5220_v60 }
0x14a4   :  { %4050 = vmatprep.subr.mxu1 %v4336_v0 }
0x14a5   :  { %4051 = vmatpush3.msra.mxu1 %v5224_v61 }
0x14a6   :  { %4052 = vmatprep.subr.mxu1 %v4336_v0 }
0x14a7   :  { %4053 = vmatpush3.msra.mxu1 %v5228_v62 }
0x14a8   :  { %4054 = vmatprep.subr.mxu1 %v4336_v0 }
0x14a9   :  { %4055 = vmatpush3.msra.mxu1 %v5232_v63 }
0x14aa   :  { %4056 = vmatprep.subr.mxu1 %v4336_v0 }
0x14ab   :  { %4057 = vmatpush3.msra.mxu1 %v5236_v25 }
0x14ac   :  { %4058 = vmatprep.subr.mxu1 %v4336_v0 }
0x14ad   :  { %4059 = vmatpush3.msra.mxu1 %v5240_v27 }
0x14ae   :  { %4060 = vmatprep.subr.mxu1 %v4336_v0 }
0x14af   :  { %4061 = vmatpush3.msra.mxu1 %v5244_v29 }
0x1550   :  { %v2238_v51 = vpop.f32.mrf.mxu1 }
0x1551   :  { %v2239_v52 = vadd.f32 %v5399_v50, %v2238_v51 }
0x1552   :  { %v3994_v53 = vpop.f32.mrf.mxu1 }
0x1553   :  { %v2242_v54 = vmul.f32 0.1, %v2239_v52 }
0x1555   :  { %v2243_v55 = vsub.f32 %v5630_v2, %v2242_v54 }
0x1557   :  { %4028 = vmatmul.mubr.f32.vlgmr.msra.gmra.mxu0 %v2243_v55 }
0x1558   :  { %4066 = vmatpush3.msra.mxu0 %v5253_v20  ;;  %4097 = vmatprep.mubr.msk.f32.mxu0 %vm4337_vm0, %v4336_v0 }
0x1559   :  { %4067 = vmatprep.subr.mxu0 %v4336_v0 }
0x155a   :  { %4068 = vmatpush3.msra.mxu0 %v5259_v22 }
0x155b   :  { %4069 = vmatprep.subr.mxu0 %v4336_v0 }
0x155c   :  { %4070 = vmatpush3.msra.mxu0 %v5263_v15 }
0x155d   :  { %4071 = vmatprep.subr.mxu0 %v4336_v0 }
0x155e   :  { %4072 = vmatpush3.msra.mxu0 %v5267_v24 }
0x155f   :  { %4073 = vmatprep.subr.mxu0 %v4336_v0 }
0x1560   :  { %4074 = vmatpush3.msra.mxu0 %v5271_v26 }
0x1561   :  { %4075 = vmatprep.subr.mxu0 %v4336_v0 }
0x1562   :  { %4076 = vmatpush3.msra.mxu0 %v5275_v35 }
0x1563   :  { %4077 = vmatprep.subr.mxu0 %v4336_v0 }
0x1564   :  { %4078 = vmatpush3.msra.mxu0 %v5279_v36 }
0x1565   :  { %4079 = vmatprep.subr.mxu0 %v4336_v0 }
0x1566   :  { %4080 = vmatpush3.msra.mxu0 %v5283_v37 }
0x1567   :  { %4081 = vmatprep.subr.mxu0 %v4336_v0 }
0x1568   :  { %4082 = vmatpush3.msra.mxu0 %v5287_v38 }
0x1569   :  { %4083 = vmatprep.subr.mxu0 %v4336_v0 }
0x156a   :  { %4084 = vmatpush3.msra.mxu0 %v5291_v39 }
0x156b   :  { %4085 = vmatprep.subr.mxu0 %v4336_v0 }
0x156c   :  { %4086 = vmatpush3.msra.mxu0 %v5295_v40 }
0x156d   :  { %4087 = vmatprep.subr.mxu0 %v4336_v0 }
0x156e   :  { %4088 = vmatpush3.msra.mxu0 %v5299_v41 }
0x156f   :  { %4089 = vmatprep.subr.mxu0 %v4336_v0 }
0x1570   :  { %4090 = vmatpush3.msra.mxu0 %v5303_v42 }
0x1571   :  { %4091 = vmatprep.subr.mxu0 %v4336_v0 }
0x1572   :  { %4092 = vmatpush3.msra.mxu0 %v5307_v43 }
0x1573   :  { %4093 = vmatprep.subr.mxu0 %v4336_v0 }
0x1574   :  { %4094 = vmatpush3.msra.mxu0 %v5311_v44 }
0x1575   :  { %4095 = vmatprep.subr.mxu0 %v4336_v0 }
0x1576   :  { %4096 = vmatpush3.msra.mxu0 %v5315_v45 }
0x1617   :  { %v2310_v57 = vpop.f32.mrf.mxu0 }
0x1618   :  { %v2314_v58 = vadd.f32 %v2310_v57, %v4639_v11 }
0x1619   :  { %v4029_v59 = vpop.f32.mrf.mxu0 }
0x161a   :  { %v2319_v60 = vadd.f32 %v2318_v56, %v2314_v58 }
0x161c   :  { %v2320_v61 = vmax.f32 %v2319_v60, 0.0 }
0x161e   :  { %4063 = vmatmul.mubr.f32.vlgmr.msra.gmra.mxu1 %v2320_v61 }
0x16de   :  { %v2387_v62 = vpop.f32.mrf.mxu1 }
0x16df   :  { %v2388_v63 = vadd.f32 %v5359_v30, %v2387_v62 }
0x16e0   :  { %v4064_v25 = vpop.f32.mrf.mxu1 }
0x16e1   :  { %v2391_v27 = vmax.f32 %v2388_v63, 0.0 }
0x16e3   :  { %4098 = vmatmul.mubr.f32.vlgmr.msra.gmra.mxu0 %v2391_v27 }
0x17a3   :  { %v2458_v0 = vpop.f32.mrf.mxu0 }
0x17a4   :  { %v2459_v29 = vadd.f32 %v5399_v50, %v2458_v0 }
0x17a5   :  { %v4099_v20 = vpop.f32.mrf.mxu0 }
0x17a6   :  { %v2462_v3 = vmul.f32 0.1, %v2459_v29 }
0x17a8   :  { %v2463_v34 = vsub.f32 %v2243_v55, %v2462_v3 }
0x17aa   :  { %v2487_v22 = vclamps-f32 %v2463_v34, 1.0 }
0x17ac   :  { %2466 = vst [vmem:[#allocation13] sm:$0xff] %v2487_v22 }
0x17ad   :  { %4309 = shalt.err (!%p4306_p6)
}
0x17ae   :  { %2476 = dma.vmem_to_hbm [thread:$0]  %s2474_s25, 128, %s5776_s9, [#allocation4]  }
0x17af   :  { %4326 = dma.done.wait [#allocation4], 128  }
0x17b0   :  { %4327 = vsyncadd [#allocation4], 4294967168 }
0x17b1   :  { %2480 = vsyncpa [#allocation3], 1 }
0x17b2   :  { %2481 = vsyncpa [#allocation6], 1 }
0x17b3   :  { %2482 = vsyncpa [#allocation9], 1 }
0x17b4   :  { %2483 = vsyncpa [#allocation12], 1 }
0x17b5   :  { %2484 = vsyncpa [#allocation4], 1 }

</bundles_post_ra>
